<compile_context>
chip_gen: v7x
topology: tpu7x:2x2x1
jax: 0.10.0
libtpu: 0.0.40
codegen_flags: <defaults>
</compile_context>

<pallas_src>
import functools

import jax
import jax.numpy as jnp
from jax import lax
from jax.experimental import pallas as pl
from jax.experimental.pallas import tpu as pltpu

EPS = 1e-5
_VMEM_LIMIT = 32 * 1024 * 1024     # conservative; fits v5e/v6e/v7x scoped VMEM
_K_TILE_THRESHOLD = 2048           # below this, use one full (unpadded) K block


# ----------------------------- small helpers --------------------------------


def _round_up(x, m):
    return (x + m - 1) // m * m


def _pick_tile(n, cands):
    for c in cands:
        if c <= n and n % c == 0:
            return c
    return n


def _m_tiling(m):
    """Row (M) tiling: >=2 tiles whenever possible (v7x megacore), <=512 rows per
    tile, and pad only up to the tile actually chosen."""
    for tm in (512, 256, 128, 64, 32, 16, 8):
        if 2 * tm <= m:
            return _round_up(m, tm), tm
    mp = _round_up(m, 8)
    return mp, mp


def _k_tiling(k):
    """K (reduction) tiling: small K -> one full unpadded block (block == full dim is
    legal); big K -> pad to 128 and tile (128-aligned suffices for v5e's 4x128 MXU;
    512/256 also feed the 256-wide v6e/v7x MXU without internal padding)."""
    if k <= _K_TILE_THRESHOLD:
        return k, k
    kp = _round_up(k, 128)
    return kp, _pick_tile(kp, (512, 256, 128))


def _lane_layout(mp, c):
    """Fold (Mp, C) into a lane-dense (rows, lanes) layout for elementwise kernels,
    and pick a row tile that gives >=2 tiles when possible (v7x)."""
    if c % 128 != 0 and 128 % c == 0 and (mp * c) % 128 == 0:
        lanes = 128
    else:
        lanes = c  # already lane-dense if C % 128 == 0; sparse fallback otherwise
    rows = (mp * c) // lanes
    tr = rows
    for cand in (2048, 1024, 512, 256, 128, 64, 32, 16, 8):
        if rows % cand == 0 and rows // cand >= 2:
            tr = cand
            break
    return rows, lanes, tr


def _pad2(x, rows, cols):
    r, c = x.shape
    if rows == r and cols == c:
        return x
    return jnp.pad(x, ((0, rows - r), (0, cols - c)))


# ----------------------------- Pallas kernels -------------------------------


def _conv_stats_kernel(a_ref, w_ref, y_ref, stats_ref, acc_ref):
    # y = A @ W over a K-tiled reduction; per-M-tile channel sum / sum-of-squares
    # computed from the f32 accumulator; y stored bf16.
    k = pl.program_id(1)

    @pl.when(k == 0)
    def _init():
        acc_ref[...] = jnp.zeros_like(acc_ref)

    acc_ref[...] += jnp.dot(a_ref[...], w_ref[...],
                            preferred_element_type=jnp.float32)

    @pl.when(k == pl.num_programs(1) - 1)
    def _finalize():
        y = acc_ref[...]
        y_ref[...] = y.astype(y_ref.dtype)
        stats_ref[0, 0:1, :] = jnp.sum(y, axis=0, keepdims=True)
        stats_ref[0, 1:2, :] = jnp.sum(y * y, axis=0, keepdims=True)


def _conv_stats_shortcut_kernel(a_ref, w_ref, xs_ref, ws_ref,
                                y_ref, stats_ref, z_ref, zstats_ref, acc_ref):
    # Same as above, plus the (tiny-K) 1x1 projection shortcut fused in.
    k = pl.program_id(1)

    @pl.when(k == 0)
    def _init():
        acc_ref[...] = jnp.zeros_like(acc_ref)
        z = jnp.dot(xs_ref[...], ws_ref[...], preferred_element_type=jnp.float32)
        z_ref[...] = z.astype(z_ref.dtype)
        zstats_ref[0, 0:1, :] = jnp.sum(z, axis=0, keepdims=True)
        zstats_ref[0, 1:2, :] = jnp.sum(z * z, axis=0, keepdims=True)

    acc_ref[...] += jnp.dot(a_ref[...], w_ref[...],
                            preferred_element_type=jnp.float32)

    @pl.when(k == pl.num_programs(1) - 1)
    def _finalize():
        y = acc_ref[...]
        y_ref[...] = y.astype(y_ref.dtype)
        stats_ref[0, 0:1, :] = jnp.sum(y, axis=0, keepdims=True)
        stats_ref[0, 1:2, :] = jnp.sum(y * y, axis=0, keepdims=True)


def _scale_bias_relu_kernel(y_ref, scale_ref, bias_ref, o_ref):
    # BN apply (+ReLU) on a lane-dense tile; all math in f32, cast only at the store.
    v = y_ref[...].astype(jnp.float32) * scale_ref[...] + bias_ref[...]
    o_ref[...] = jnp.maximum(v, 0.0).astype(o_ref.dtype)


def _residual_epilogue_kernel(y_ref, s_ref, sc2_ref, b2_ref, scs_ref, bss_ref,
                              *o_refs, emit_pre):
    # pre = BN2(y) + BN_s(shortcut); out = relu(pre). Lane-dense tiles, f32 math,
    # bf16 inputs up-cast on the VPU (no host-side astype / padded f32 copies).
    y = y_ref[...].astype(jnp.float32)
    s = s_ref[...].astype(jnp.float32)
    pre = (y * sc2_ref[...] + b2_ref[...]) + (s * scs_ref[...] + bss_ref[...])
    o_refs[0][...] = jnp.maximum(pre, 0.0).astype(o_refs[0].dtype)
    if emit_pre:
        o_refs[1][...] = pre.astype(o_refs[1].dtype)


# ----------------------------- pallas_call wrappers --------------------------


def _conv_compiler_params():
    return pltpu.CompilerParams(dimension_semantics=("parallel", "arbitrary"),
                                vmem_limit_bytes=_VMEM_LIMIT)


def _ew_compiler_params():
    return pltpu.CompilerParams(dimension_semantics=("parallel",),
                                vmem_limit_bytes=_VMEM_LIMIT)


def _conv_cost(mp, kp, c, nm, extra_flops=0, extra_bytes=0):
    flops = 2 * mp * kp * c + extra_flops
    bytes_accessed = (mp * kp * 2 + kp * c * 2 + mp * c * 2
                      + nm * 2 * c * 4 + extra_bytes)
    return pl.CostEstimate(flops=flops, transcendentals=0,
                           bytes_accessed=bytes_accessed)


def conv_stats(a, w, *, tm, tk):
    mp, kp = a.shape
    c = w.shape[1]
    nm, nk = mp // tm, kp // tk
    return pl.pallas_call(
        _conv_stats_kernel,
        out_shape=(jax.ShapeDtypeStruct((mp, c), jnp.bfloat16),
                   jax.ShapeDtypeStruct((nm, 2, c), jnp.float32)),
        grid_spec=pltpu.PrefetchScalarGridSpec(
            num_scalar_prefetch=0, grid=(nm, nk),
            in_specs=[pl.BlockSpec((tm, tk), lambda i, k: (i, k)),
                      pl.BlockSpec((tk, c), lambda i, k: (k, 0))],
            out_specs=(pl.BlockSpec((tm, c), lambda i, k: (i, 0)),
                       pl.BlockSpec((1, 2, c), lambda i, k: (i, 0, 0))),
            scratch_shapes=[pltpu.VMEM((tm, c), jnp.float32)]),
        compiler_params=_conv_compiler_params(),
        cost_estimate=_conv_cost(mp, kp, c, nm),
    )(a, w)


def conv_stats_shortcut(a, w, xs, ws, *, tm, tk):
    mp, kp = a.shape
    c = w.shape[1]
    cin = xs.shape[1]
    nm, nk = mp // tm, kp // tk
    return pl.pallas_call(
        _conv_stats_shortcut_kernel,
        out_shape=(jax.ShapeDtypeStruct((mp, c), jnp.bfloat16),
                   jax.ShapeDtypeStruct((nm, 2, c), jnp.float32),
                   jax.ShapeDtypeStruct((mp, c), jnp.bfloat16),
                   jax.ShapeDtypeStruct((nm, 2, c), jnp.float32)),
        grid_spec=pltpu.PrefetchScalarGridSpec(
            num_scalar_prefetch=0, grid=(nm, nk),
            in_specs=[pl.BlockSpec((tm, tk), lambda i, k: (i, k)),
                      pl.BlockSpec((tk, c), lambda i, k: (k, 0)),
                      pl.BlockSpec((tm, cin), lambda i, k: (i, 0)),
                      pl.BlockSpec((cin, c), lambda i, k: (0, 0))],
            out_specs=(pl.BlockSpec((tm, c), lambda i, k: (i, 0)),
                       pl.BlockSpec((1, 2, c), lambda i, k: (i, 0, 0)),
                       pl.BlockSpec((tm, c), lambda i, k: (i, 0)),
                       pl.BlockSpec((1, 2, c), lambda i, k: (i, 0, 0))),
            scratch_shapes=[pltpu.VMEM((tm, c), jnp.float32)]),
        compiler_params=_conv_compiler_params(),
        cost_estimate=_conv_cost(mp, kp, c, nm,
                                 extra_flops=2 * mp * cin * c,
                                 extra_bytes=mp * cin * 2 + cin * c * 2
                                             + mp * c * 2 + nm * 2 * c * 4),
    )(a, w, xs, ws)


def scale_bias_relu(y_flat, scale_l, bias_l, *, tr, out_dtype):
    rows, lanes = y_flat.shape
    row_spec = pl.BlockSpec((tr, lanes), lambda i: (i, 0))
    vec_spec = pl.BlockSpec((1, lanes), lambda i: (0, 0))
    return pl.pallas_call(
        _scale_bias_relu_kernel,
        out_shape=jax.ShapeDtypeStruct((rows, lanes), out_dtype),
        grid_spec=pltpu.PrefetchScalarGridSpec(
            num_scalar_prefetch=0, grid=(rows // tr,),
            in_specs=[row_spec, vec_spec, vec_spec],
            out_specs=row_spec),
        compiler_params=_ew_compiler_params(),
    )(y_flat,
      scale_l.reshape(1, lanes).astype(jnp.float32),
      bias_l.reshape(1, lanes).astype(jnp.float32))


def residual_epilogue(y_flat, s_flat, scale2, bias2, sscale, sbias, *, tr, emit_pre):
    rows, lanes = y_flat.shape
    row_spec = pl.BlockSpec((tr, lanes), lambda i: (i, 0))
    vec_spec = pl.BlockSpec((1, lanes), lambda i: (0, 0))
    sds = jax.ShapeDtypeStruct((rows, lanes), jnp.float32)
    if emit_pre:
        out_shape, out_specs = (sds, sds), (row_spec, row_spec)
    else:
        out_shape, out_specs = sds, row_spec
    vec = lambda v: v.reshape(1, lanes).astype(jnp.float32)
    return pl.pallas_call(
        functools.partial(_residual_epilogue_kernel, emit_pre=emit_pre),
        out_shape=out_shape,
        grid_spec=pltpu.PrefetchScalarGridSpec(
            num_scalar_prefetch=0, grid=(rows // tr,),
            in_specs=[row_spec, row_spec, vec_spec, vec_spec, vec_spec, vec_spec],
            out_specs=out_specs),
        compiler_params=_ew_compiler_params(),
    )(y_flat, s_flat, vec(scale2), vec(bias2), vec(sscale), vec(sbias))


# ----------------------------- glue (plain JAX) ------------------------------


def im2col_3x3(x_nhwc, stride):
    """3x3, padding=1 im2col.  Returns (M, 9*C) matrix and output spatial dims."""
    N, H, W, C = x_nhwc.shape
    Ho = (H + 2 - 3) // stride + 1
    Wo = (W + 2 - 3) // stride + 1
    xp = jnp.pad(x_nhwc, ((0, 0), (1, 1), (1, 1), (0, 0)))
    patches = []
    for kh in range(3):
        for kw in range(3):
            patches.append(
                lax.slice(
                    xp,
                    (0, kh, kw, 0),
                    (N, kh + (Ho - 1) * stride + 1, kw + (Wo - 1) * stride + 1, C),
                    (1, stride, stride, 1)))
    a = jnp.concatenate(patches, axis=-1)  # (N, Ho, Wo, 9*C), order [kh][kw][cin]
    return a.reshape(N * Ho * Wo, 9 * C), (N, Ho, Wo)


def conv3x3_weight_to_mat(w_oihw):
    cout, cin, _, _ = w_oihw.shape
    return jnp.transpose(w_oihw, (2, 3, 1, 0)).reshape(9 * cin, cout)


def _bn_scale_bias(stats, m_true, gamma, beta):
    """Reduce per-tile (sum, sum_sq) partials into per-channel BN scale/bias."""
    s = jnp.sum(stats[:, 0, :], axis=0)
    ss = jnp.sum(stats[:, 1, :], axis=0)
    mean = s / m_true
    var = jnp.maximum(ss / m_true - mean * mean, 0.0)   # biased (training) variance
    scale = gamma * lax.rsqrt(var + EPS)
    bias = beta - mean * scale
    return scale, bias


class BasicBlockPallas:
    expansion = 1

    def __init__(self, in_planes, planes, stride=1, is_last=False, *, key):
        self.in_planes = in_planes
        self.planes = planes
        self.stride = stride
        self.is_last = is_last
        self.has_shortcut = stride != 1 or in_planes != self.expansion * planes

        ks = jax.random.split(key, 8)
        self.w1 = jax.random.normal(ks[0], (planes, in_planes, 3, 3), jnp.float32)
        self.w1 = self.w1 / jnp.sqrt(9.0 * in_planes)
        self.g1 = 1.0 + 0.1 * jax.random.normal(ks[1], (planes,), jnp.float32)
        self.b1 = 0.1 * jax.random.normal(ks[2], (planes,), jnp.float32)

        self.w2 = jax.random.normal(ks[3], (planes, planes, 3, 3), jnp.float32)
        self.w2 = self.w2 / jnp.sqrt(9.0 * planes)
        self.g2 = 1.0 + 0.1 * jax.random.normal(ks[4], (planes,), jnp.float32)
        self.b2 = 0.1 * jax.random.normal(ks[5], (planes,), jnp.float32)

        if self.has_shortcut:
            cout = self.expansion * planes
            self.ws = jax.random.normal(ks[6], (cout, in_planes, 1, 1), jnp.float32)
            self.ws = self.ws / jnp.sqrt(float(in_planes))
            self.gs = 1.0 + 0.1 * jax.random.normal(ks[7], (cout,), jnp.float32)
            self.bs = jnp.zeros((cout,), jnp.float32)

    def __call__(self, x_nchw):
        x = jnp.transpose(x_nchw, (0, 2, 3, 1)).astype(jnp.float32)   # NHWC f32
        N, H, W, Cin = x.shape
        C = self.planes
        x_bf = x.astype(jnp.bfloat16)                                 # bf16 MXU operands

        # ---- conv1 (+ fused 1x1 shortcut conv) + per-tile BN stats -----------
        a1, (Nn, Ho, Wo) = im2col_3x3(x_bf, self.stride)
        M = Nn * Ho * Wo
        Mp, tm = _m_tiling(M)
        K1p, tk1 = _k_tiling(a1.shape[1])
        a1p = _pad2(a1, Mp, K1p)
        w1m = _pad2(conv3x3_weight_to_mat(self.w1).astype(jnp.bfloat16), K1p, C)

        if self.has_shortcut:
            xs = x_bf[:, ::self.stride, ::self.stride, :].reshape(M, Cin)
            xsp = _pad2(xs, Mp, Cin)
            wsm = self.ws.reshape(C, Cin).T.astype(jnp.bfloat16)
            y1, st1, zs, sst = conv_stats_shortcut(a1p, w1m, xsp, wsm, tm=tm, tk=tk1)
            sscale, sbias = _bn_scale_bias(sst, M, self.gs, self.bs)
            sc_full = zs                                              # (Mp, C) bf16
        else:
            y1, st1 = conv_stats(a1p, w1m, tm=tm, tk=tk1)
            sc_full = _pad2(x_bf.reshape(M, Cin), Mp, Cin)            # identity, bf16
            sscale = jnp.ones((C,), jnp.float32)
            sbias = jnp.zeros((C,), jnp.float32)

        scale1, bias1 = _bn_scale_bias(st1, M, self.g1, self.b1)

        # ---- BN1 + ReLU (lane-dense elementwise), emit bf16 for conv2 --------
        rows, lanes, tr = _lane_layout(Mp, C)
        rep = lanes // C
        out1_flat = scale_bias_relu(y1.reshape(rows, lanes),
                                    jnp.tile(scale1, rep), jnp.tile(bias1, rep),
                                    tr=tr, out_dtype=jnp.bfloat16)
        out1_nhwc = out1_flat.reshape(Mp, C)[:M].reshape(Nn, Ho, Wo, C)

        # ---- conv2 + per-tile BN stats ---------------------------------------
        a2, _ = im2col_3x3(out1_nhwc, 1)
        K2p, tk2 = _k_tiling(a2.shape[1])
        a2p = _pad2(a2, Mp, K2p)
        w2m = _pad2(conv3x3_weight_to_mat(self.w2).astype(jnp.bfloat16), K2p, C)
        y2, st2 = conv_stats(a2p, w2m, tm=tm, tk=tk2)
        scale2, bias2 = _bn_scale_bias(st2, M, self.g2, self.b2)

        # ---- BN2 + shortcut-BN + residual add + ReLU (lane-dense) ------------
        res = residual_epilogue(y2.reshape(rows, lanes), sc_full.reshape(rows, lanes),
                                jnp.tile(scale2, rep), jnp.tile(bias2, rep),
                                jnp.tile(sscale, rep), jnp.tile(sbias, rep),
                                tr=tr, emit_pre=self.is_last)

        def to_nchw(flat):
            return jnp.transpose(flat.reshape(Mp, C)[:M].reshape(Nn, Ho, Wo, C),
                                 (0, 3, 1, 2))

        if self.is_last:
            out_flat, pre_flat = res
            return to_nchw(out_flat), to_nchw(pre_flat)
        return to_nchw(res)


# ----------------------------- pure-JAX reference ----------------------------
# Matches the kernel's precision: bf16 conv operands with f32 accumulation, BN
# statistics from the f32 conv result, BN applied to the bf16-rounded conv result,
# bf16 shortcut, training-mode (biased) batch statistics.


def _ref_conv(x, w, stride, pad):
    return lax.conv_general_dilated(
        x.astype(jnp.bfloat16), w.astype(jnp.bfloat16), (stride, stride), pad,
        dimension_numbers=("NCHW", "OIHW", "NCHW"),
        preferred_element_type=jnp.float32)


def _ref_bn_apply(y_f32, g, b):
    mean = y_f32.mean(axis=(0, 2, 3), keepdims=True)
    var = ((y_f32 - mean) ** 2).mean(axis=(0, 2, 3), keepdims=True)
    scale = g.reshape(1, -1, 1, 1) * lax.rsqrt(var + EPS)
    bias = b.reshape(1, -1, 1, 1) - mean * scale
    y_bf = y_f32.astype(jnp.bfloat16).astype(jnp.float32)
    return y_bf * scale + bias


def ref_forward(blk, x):
    y1 = _ref_conv(x, blk.w1, blk.stride, ((1, 1), (1, 1)))
    out1 = jax.nn.relu(_ref_bn_apply(y1, blk.g1, blk.b1)).astype(jnp.bfloat16)
    y2 = _ref_conv(out1.astype(jnp.float32), blk.w2, 1, ((1, 1), (1, 1)))
    bn2 = _ref_bn_apply(y2, blk.g2, blk.b2)
    if blk.has_shortcut:
        ys = _ref_conv(x, blk.ws, blk.stride, ((0, 0), (0, 0)))
        sc = _ref_bn_apply(ys, blk.gs, blk.bs)
    else:
        sc = x.astype(jnp.bfloat16).astype(jnp.float32)
    pre = bn2 + sc
    return jax.nn.relu(pre), pre


# ----------------------------- main -------------------------------------------

if __name__ == "__main__":
    key = jax.random.PRNGKey(0)
    k_x, k_p, k_p2 = jax.random.split(key, 3)

    # Case 1: stride-2 block with projection shortcut, is_last=True.
    x = jax.random.normal(k_x, (2, 4, 16, 16), jnp.float32)
    block = BasicBlockPallas(in_planes=4, planes=8, stride=2, is_last=True, key=k_p)
    out, preact = jax.jit(block.__call__)(x)
    out = jax.block_until_ready(out)
    preact = jax.block_until_ready(preact)

    ref_out, ref_pre = ref_forward(block, x)
    assert out.shape == (2, 8, 8, 8) and preact.shape == (2, 8, 8, 8)
    assert jnp.allclose(out, ref_out, atol=1e-2, rtol=1e-2), \
        float(jnp.max(jnp.abs(out - ref_out)))
    assert jnp.allclose(preact, ref_pre, atol=1e-2, rtol=1e-2), \
        float(jnp.max(jnp.abs(preact - ref_pre)))

    # Case 2: identity-shortcut block (stride 1, in_planes == planes), is_last=False.
    x2 = jax.random.normal(k_x, (2, 8, 16, 16), jnp.float32)
    block2 = BasicBlockPallas(in_planes=8, planes=8, stride=1, is_last=False, key=k_p2)
    out2 = jax.block_until_ready(jax.jit(block2.__call__)(x2))
    ref_out2, _ = ref_forward(block2, x2)
    assert out2.shape == (2, 8, 16, 16)
    assert jnp.allclose(out2, ref_out2, atol=1e-2, rtol=1e-2), \
        float(jnp.max(jnp.abs(out2 - ref_out2)))

    print("KERNEL_OK")
</pallas_src>

<mosaic_0001>
module attributes {stable_mosaic.version = 11 : i64} {
  func.func @_conv_stats_shortcut_kernel(%arg0: i32, %arg1: i32, %arg2: memref<64x36xbf16, #tpu.memory_space<vmem>>, %arg3: memref<36x8xbf16, #tpu.memory_space<vmem>>, %arg4: memref<64x4xbf16, #tpu.memory_space<vmem>>, %arg5: memref<4x8xbf16, #tpu.memory_space<vmem>>, %arg6: memref<64x8xbf16, #tpu.memory_space<vmem>>, %arg7: memref<1x2x8xf32, #tpu.memory_space<vmem>>, %arg8: memref<64x8xbf16, #tpu.memory_space<vmem>>, %arg9: memref<1x2x8xf32, #tpu.memory_space<vmem>>, %arg10: memref<64x8xf32, #tpu.memory_space<vmem>>) attributes {dimension_semantics = [#tpu.dimension_semantics<parallel>, #tpu.dimension_semantics<arbitrary>], iteration_bounds = array<i64: 2, 1>, scalar_prefetch = 0 : i64, scratch_operands = 1 : i64, tpu.core_type = #tpu.core_type<tc>, window_params = [{transform_indices = @transform_0, window_bounds = array<i64: 64, 36>}, {transform_indices = @transform_1, window_bounds = array<i64: 36, 8>}, {transform_indices = @transform_2, window_bounds = array<i64: 64, 4>}, {pipeline_mode = #tpu.pipeline_mode<synchronous>, transform_indices = @transform_3, window_bounds = array<i64: 4, 8>}, {transform_indices = @transform_4, window_bounds = array<i64: 64, 8>}, {transform_indices = @transform_5, window_bounds = array<i64: 1, 2, 8>}, {transform_indices = @transform_6, window_bounds = array<i64: 64, 8>}, {transform_indices = @transform_7, window_bounds = array<i64: 1, 2, 8>}]} {
    %c0_i32 = arith.constant 0 : i32
    %0 = arith.cmpi eq, %arg1, %c0_i32 : i32
    %1 = arith.extui %0 : i1 to i32
    %c0_i32_0 = arith.constant 0 : i32
    %2 = arith.cmpi ne, %1, %c0_i32_0 : i32
    scf.if %2 {
      %cst_10 = arith.constant 0.000000e+00 : f32
      %12 = vector.broadcast %cst_10 : f32 to vector<64x8xf32>
      %c0_11 = arith.constant 0 : index
      %c0_12 = arith.constant 0 : index
      %13 = vector.load %arg10[%c0_11, %c0_12] : memref<64x8xf32, #tpu.memory_space<vmem>>, vector<64x8xf32>
      tpu.vector_store %arg10[%c0_11, %c0_12], %12 {strides = array<i32>} : memref<64x8xf32, #tpu.memory_space<vmem>>, vector<64x8xf32>,
      %c0_13 = arith.constant 0 : index
      %c0_14 = arith.constant 0 : index
      %14 = vector.load %arg4[%c0_13, %c0_14] : memref<64x4xbf16, #tpu.memory_space<vmem>>, vector<64x4xbf16>
      %c0_15 = arith.constant 0 : index
      %c0_16 = arith.constant 0 : index
      %15 = vector.load %arg5[%c0_15, %c0_16] : memref<4x8xbf16, #tpu.memory_space<vmem>>, vector<4x8xbf16>
      %cst_17 = arith.constant dense<0.000000e+00> : vector<64x8xf32>
      %16 = tpu.matmul %14, %15, %cst_17 {dimension_numbers = #tpu.dot_dimension_numbers<[1], [0], [0], [1], [0, 0, 1, 1], [], []>} : vector<64x4xbf16>, vector<4x8xbf16>, vector<64x8xf32> -> vector<64x8xf32>
      %17 = arith.truncf %16 : vector<64x8xf32> to vector<64x8xbf16>
      %c0_18 = arith.constant 0 : index
      %c0_19 = arith.constant 0 : index
      %18 = vector.load %arg8[%c0_18, %c0_19] : memref<64x8xbf16, #tpu.memory_space<vmem>>, vector<64x8xbf16>
      tpu.vector_store %arg8[%c0_18, %c0_19], %17 {strides = array<i32>} : memref<64x8xbf16, #tpu.memory_space<vmem>>, vector<64x8xbf16>,
      %cst_20 = arith.constant dense<0.000000e+00> : vector<8xf32>
      %19 = vector.multi_reduction <add>, %16, %cst_20 [0] : vector<64x8xf32> to vector<8xf32>
      %20 = vector.shape_cast %19 : vector<8xf32> to vector<1x8xf32>
      %c0_21 = arith.constant 0 : index
      %c0_22 = arith.constant 0 : index
      %c0_23 = arith.constant 0 : index
      %21 = vector.load %arg9[%c0_21, %c0_22, %c0_23] : memref<1x2x8xf32, #tpu.memory_space<vmem>>, vector<1x1x8xf32>
      %22 = vector.shape_cast %21 : vector<1x1x8xf32> to vector<1x8xf32>
      %23 = vector.shape_cast %20 : vector<1x8xf32> to vector<1x1x8xf32>
      tpu.vector_store %arg9[%c0_21, %c0_22, %c0_23], %23 {strides = array<i32>} : memref<1x2x8xf32, #tpu.memory_space<vmem>>, vector<1x1x8xf32>,
      %24 = arith.mulf %16, %16 : vector<64x8xf32>
      %cst_24 = arith.constant dense<0.000000e+00> : vector<8xf32>
      %25 = vector.multi_reduction <add>, %24, %cst_24 [0] : vector<64x8xf32> to vector<8xf32>
      %26 = vector.shape_cast %25 : vector<8xf32> to vector<1x8xf32>
      %c0_25 = arith.constant 0 : index
      %c1 = arith.constant 1 : index
      %c0_26 = arith.constant 0 : index
      %27 = vector.load %arg9[%c0_25, %c1, %c0_26] : memref<1x2x8xf32, #tpu.memory_space<vmem>>, vector<1x1x8xf32>
      %28 = vector.shape_cast %27 : vector<1x1x8xf32> to vector<1x8xf32>
      %29 = vector.shape_cast %26 : vector<1x8xf32> to vector<1x1x8xf32>
      tpu.vector_store %arg9[%c0_25, %c1, %c0_26], %29 {strides = array<i32>} : memref<1x2x8xf32, #tpu.memory_space<vmem>>, vector<1x1x8xf32>,
    } else {
    }
    %c0 = arith.constant 0 : index
    %c0_1 = arith.constant 0 : index
    %3 = vector.load %arg10[%c0, %c0_1] : memref<64x8xf32, #tpu.memory_space<vmem>>, vector<64x8xf32>
    %c0_2 = arith.constant 0 : index
    %c0_3 = arith.constant 0 : index
    %4 = vector.load %arg2[%c0_2, %c0_3] : memref<64x36xbf16, #tpu.memory_space<vmem>>, vector<64x36xbf16>
    %c0_4 = arith.constant 0 : index
    %c0_5 = arith.constant 0 : index
    %5 = vector.load %arg3[%c0_4, %c0_5] : memref<36x8xbf16, #tpu.memory_space<vmem>>, vector<36x8xbf16>
    %cst = arith.constant dense<0.000000e+00> : vector<64x8xf32>
    %6 = tpu.matmul %4, %5, %cst {dimension_numbers = #tpu.dot_dimension_numbers<[1], [0], [0], [1], [0, 0, 1, 1], [], []>} : vector<64x36xbf16>, vector<36x8xbf16>, vector<64x8xf32> -> vector<64x8xf32>
    %7 = arith.addf %3, %6 : vector<64x8xf32>
    %c0_6 = arith.constant 0 : index
    %c0_7 = arith.constant 0 : index
    %8 = vector.load %arg10[%c0_6, %c0_7] : memref<64x8xf32, #tpu.memory_space<vmem>>, vector<64x8xf32>
    tpu.vector_store %arg10[%c0_6, %c0_7], %7 {strides = array<i32>} : memref<64x8xf32, #tpu.memory_space<vmem>>, vector<64x8xf32>,
    %c0_i32_8 = arith.constant 0 : i32
    %9 = arith.cmpi eq, %arg1, %c0_i32_8 : i32
    %10 = arith.extui %9 : i1 to i32
    %c0_i32_9 = arith.constant 0 : i32
    %11 = arith.cmpi ne, %10, %c0_i32_9 : i32
    scf.if %11 {
      %c0_10 = arith.constant 0 : index
      %c0_11 = arith.constant 0 : index
      %12 = vector.load %arg10[%c0_10, %c0_11] : memref<64x8xf32, #tpu.memory_space<vmem>>, vector<64x8xf32>
      %13 = arith.truncf %12 : vector<64x8xf32> to vector<64x8xbf16>
      %c0_12 = arith.constant 0 : index
      %c0_13 = arith.constant 0 : index
      %14 = vector.load %arg6[%c0_12, %c0_13] : memref<64x8xbf16, #tpu.memory_space<vmem>>, vector<64x8xbf16>
      tpu.vector_store %arg6[%c0_12, %c0_13], %13 {strides = array<i32>} : memref<64x8xbf16, #tpu.memory_space<vmem>>, vector<64x8xbf16>,
      %cst_14 = arith.constant dense<0.000000e+00> : vector<8xf32>
      %15 = vector.multi_reduction <add>, %12, %cst_14 [0] : vector<64x8xf32> to vector<8xf32>
      %16 = vector.shape_cast %15 : vector<8xf32> to vector<1x8xf32>
      %c0_15 = arith.constant 0 : index
      %c0_16 = arith.constant 0 : index
      %c0_17 = arith.constant 0 : index
      %17 = vector.load %arg7[%c0_15, %c0_16, %c0_17] : memref<1x2x8xf32, #tpu.memory_space<vmem>>, vector<1x1x8xf32>
      %18 = vector.shape_cast %17 : vector<1x1x8xf32> to vector<1x8xf32>
      %19 = vector.shape_cast %16 : vector<1x8xf32> to vector<1x1x8xf32>
      tpu.vector_store %arg7[%c0_15, %c0_16, %c0_17], %19 {strides = array<i32>} : memref<1x2x8xf32, #tpu.memory_space<vmem>>, vector<1x1x8xf32>,
      %20 = arith.mulf %12, %12 : vector<64x8xf32>
      %cst_18 = arith.constant dense<0.000000e+00> : vector<8xf32>
      %21 = vector.multi_reduction <add>, %20, %cst_18 [0] : vector<64x8xf32> to vector<8xf32>
      %22 = vector.shape_cast %21 : vector<8xf32> to vector<1x8xf32>
      %c0_19 = arith.constant 0 : index
      %c1 = arith.constant 1 : index
      %c0_20 = arith.constant 0 : index
      %23 = vector.load %arg7[%c0_19, %c1, %c0_20] : memref<1x2x8xf32, #tpu.memory_space<vmem>>, vector<1x1x8xf32>
      %24 = vector.shape_cast %23 : vector<1x1x8xf32> to vector<1x8xf32>
      %25 = vector.shape_cast %22 : vector<1x8xf32> to vector<1x1x8xf32>
      tpu.vector_store %arg7[%c0_19, %c1, %c0_20], %25 {strides = array<i32>} : memref<1x2x8xf32, #tpu.memory_space<vmem>>, vector<1x1x8xf32>,
    } else {
    }
    return
  }
  func.func @transform_0(%arg0: i32, %arg1: i32) -> (i32, i32) {
    %c0_i32 = arith.constant 0 : i32
    return %arg0, %arg1 : i32, i32
  }
  func.func @transform_1(%arg0: i32, %arg1: i32) -> (i32, i32) {
    %c0_i32 = arith.constant 0 : i32
    %c0_i32_0 = arith.constant 0 : i32
    return %arg1, %c0_i32 : i32, i32
  }
  func.func @transform_2(%arg0: i32, %arg1: i32) -> (i32, i32) {
    %c0_i32 = arith.constant 0 : i32
    %c0_i32_0 = arith.constant 0 : i32
    return %arg0, %c0_i32 : i32, i32
  }
  func.func @transform_3(%arg0: i32, %arg1: i32) -> (i32, i32) {
    %c0_i32 = arith.constant 0 : i32
    %c0_i32_0 = arith.constant 0 : i32
    %c0_i32_1 = arith.constant 0 : i32
    return %c0_i32, %c0_i32_0 : i32, i32
  }
  func.func @transform_4(%arg0: i32, %arg1: i32) -> (i32, i32) {
    %c0_i32 = arith.constant 0 : i32
    %c0_i32_0 = arith.constant 0 : i32
    return %arg0, %c0_i32 : i32, i32
  }
  func.func @transform_5(%arg0: i32, %arg1: i32) -> (i32, i32, i32) {
    %c0_i32 = arith.constant 0 : i32
    %c0_i32_0 = arith.constant 0 : i32
    %c0_i32_1 = arith.constant 0 : i32
    return %arg0, %c0_i32, %c0_i32_0 : i32, i32, i32
  }
  func.func @transform_6(%arg0: i32, %arg1: i32) -> (i32, i32) {
    %c0_i32 = arith.constant 0 : i32
    %c0_i32_0 = arith.constant 0 : i32
    return %arg0, %c0_i32 : i32, i32
  }
  func.func @transform_7(%arg0: i32, %arg1: i32) -> (i32, i32, i32) {
    %c0_i32 = arith.constant 0 : i32
    %c0_i32_0 = arith.constant 0 : i32
    %c0_i32_1 = arith.constant 0 : i32
    return %arg0, %c0_i32, %c0_i32_0 : i32, i32, i32
  }
}

module attributes {stable_mosaic.version = 11 : i64} {
  func.func @_scale_bias_relu_kernel(%arg0: i32, %arg1: memref<8x128xbf16, #tpu.memory_space<vmem>>, %arg2: memref<1x128xf32, #tpu.memory_space<vmem>>, %arg3: memref<1x128xf32, #tpu.memory_space<vmem>>, %arg4: memref<8x128xbf16, #tpu.memory_space<vmem>>) attributes {dimension_semantics = [#tpu.dimension_semantics<parallel>], iteration_bounds = array<i64: 1>, scalar_prefetch = 0 : i64, scratch_operands = 0 : i64, tpu.core_type = #tpu.core_type<tc>, window_params = [{transform_indices = @transform_0, window_bounds = array<i64: 8, 128>}, {pipeline_mode = #tpu.pipeline_mode<synchronous>, transform_indices = @transform_1, window_bounds = array<i64: 1, 128>}, {pipeline_mode = #tpu.pipeline_mode<synchronous>, transform_indices = @transform_2, window_bounds = array<i64: 1, 128>}, {transform_indices = @transform_3, window_bounds = array<i64: 8, 128>}]} {
    %c0 = arith.constant 0 : index
    %c0_0 = arith.constant 0 : index
    %0 = vector.load %arg1[%c0, %c0_0] : memref<8x128xbf16, #tpu.memory_space<vmem>>, vector<8x128xbf16>
    %1 = arith.extf %0 : vector<8x128xbf16> to vector<8x128xf32>
    %c0_1 = arith.constant 0 : index
    %c0_2 = arith.constant 0 : index
    %2 = vector.load %arg2[%c0_1, %c0_2] : memref<1x128xf32, #tpu.memory_space<vmem>>, vector<1x128xf32>
    %3 = vector.broadcast %2 : vector<1x128xf32> to vector<8x128xf32>
    %4 = arith.mulf %1, %3 : vector<8x128xf32>
    %c0_3 = arith.constant 0 : index
    %c0_4 = arith.constant 0 : index
    %5 = vector.load %arg3[%c0_3, %c0_4] : memref<1x128xf32, #tpu.memory_space<vmem>>, vector<1x128xf32>
    %6 = vector.broadcast %5 : vector<1x128xf32> to vector<8x128xf32>
    %7 = arith.addf %4, %6 : vector<8x128xf32>
    %cst = arith.constant 0.000000e+00 : f32
    %8 = vector.broadcast %cst : f32 to vector<8x128xf32>
    %9 = arith.maximumf %7, %8 : vector<8x128xf32>
    %10 = arith.truncf %9 : vector<8x128xf32> to vector<8x128xbf16>
    %c0_5 = arith.constant 0 : index
    %c0_6 = arith.constant 0 : index
    %11 = vector.load %arg4[%c0_5, %c0_6] : memref<8x128xbf16, #tpu.memory_space<vmem>>, vector<8x128xbf16>
    tpu.vector_store %arg4[%c0_5, %c0_6], %10 {strides = array<i32>} : memref<8x128xbf16, #tpu.memory_space<vmem>>, vector<8x128xbf16>,
    return
  }
  func.func @transform_0(%arg0: i32) -> (i32, i32) {
    %c0_i32 = arith.constant 0 : i32
    %c0_i32_0 = arith.constant 0 : i32
    return %arg0, %c0_i32 : i32, i32
  }
  func.func @transform_1(%arg0: i32) -> (i32, i32) {
    %c0_i32 = arith.constant 0 : i32
    %c0_i32_0 = arith.constant 0 : i32
    %c0_i32_1 = arith.constant 0 : i32
    return %c0_i32, %c0_i32_0 : i32, i32
  }
  func.func @transform_2(%arg0: i32) -> (i32, i32) {
    %c0_i32 = arith.constant 0 : i32
    %c0_i32_0 = arith.constant 0 : i32
    %c0_i32_1 = arith.constant 0 : i32
    return %c0_i32, %c0_i32_0 : i32, i32
  }
  func.func @transform_3(%arg0: i32) -> (i32, i32) {
    %c0_i32 = arith.constant 0 : i32
    %c0_i32_0 = arith.constant 0 : i32
    return %arg0, %c0_i32 : i32, i32
  }
}

module attributes {stable_mosaic.version = 11 : i64} {
  func.func @_conv_stats_kernel(%arg0: i32, %arg1: i32, %arg2: memref<64x72xbf16, #tpu.memory_space<vmem>>, %arg3: memref<72x8xbf16, #tpu.memory_space<vmem>>, %arg4: memref<64x8xbf16, #tpu.memory_space<vmem>>, %arg5: memref<1x2x8xf32, #tpu.memory_space<vmem>>, %arg6: memref<64x8xf32, #tpu.memory_space<vmem>>) attributes {dimension_semantics = [#tpu.dimension_semantics<parallel>, #tpu.dimension_semantics<arbitrary>], iteration_bounds = array<i64: 2, 1>, scalar_prefetch = 0 : i64, scratch_operands = 1 : i64, tpu.core_type = #tpu.core_type<tc>, window_params = [{transform_indices = @transform_0, window_bounds = array<i64: 64, 72>}, {transform_indices = @transform_1, window_bounds = array<i64: 72, 8>}, {transform_indices = @transform_2, window_bounds = array<i64: 64, 8>}, {transform_indices = @transform_3, window_bounds = array<i64: 1, 2, 8>}]} {
    %c0_i32 = arith.constant 0 : i32
    %0 = arith.cmpi eq, %arg1, %c0_i32 : i32
    %1 = arith.extui %0 : i1 to i32
    %c0_i32_0 = arith.constant 0 : i32
    %2 = arith.cmpi ne, %1, %c0_i32_0 : i32
    scf.if %2 {
      %cst_10 = arith.constant 0.000000e+00 : f32
      %12 = vector.broadcast %cst_10 : f32 to vector<64x8xf32>
      %c0_11 = arith.constant 0 : index
      %c0_12 = arith.constant 0 : index
      %13 = vector.load %arg6[%c0_11, %c0_12] : memref<64x8xf32, #tpu.memory_space<vmem>>, vector<64x8xf32>
      tpu.vector_store %arg6[%c0_11, %c0_12], %12 {strides = array<i32>} : memref<64x8xf32, #tpu.memory_space<vmem>>, vector<64x8xf32>,
    } else {
    }
    %c0 = arith.constant 0 : index
    %c0_1 = arith.constant 0 : index
    %3 = vector.load %arg6[%c0, %c0_1] : memref<64x8xf32, #tpu.memory_space<vmem>>, vector<64x8xf32>
    %c0_2 = arith.constant 0 : index
    %c0_3 = arith.constant 0 : index
    %4 = vector.load %arg2[%c0_2, %c0_3] : memref<64x72xbf16, #tpu.memory_space<vmem>>, vector<64x72xbf16>
    %c0_4 = arith.constant 0 : index
    %c0_5 = arith.constant 0 : index
    %5 = vector.load %arg3[%c0_4, %c0_5] : memref<72x8xbf16, #tpu.memory_space<vmem>>, vector<72x8xbf16>
    %cst = arith.constant dense<0.000000e+00> : vector<64x8xf32>
    %6 = tpu.matmul %4, %5, %cst {dimension_numbers = #tpu.dot_dimension_numbers<[1], [0], [0], [1], [0, 0, 1, 1], [], []>} : vector<64x72xbf16>, vector<72x8xbf16>, vector<64x8xf32> -> vector<64x8xf32>
    %7 = arith.addf %3, %6 : vector<64x8xf32>
    %c0_6 = arith.constant 0 : index
    %c0_7 = arith.constant 0 : index
    %8 = vector.load %arg6[%c0_6, %c0_7] : memref<64x8xf32, #tpu.memory_space<vmem>>, vector<64x8xf32>
    tpu.vector_store %arg6[%c0_6, %c0_7], %7 {strides = array<i32>} : memref<64x8xf32, #tpu.memory_space<vmem>>, vector<64x8xf32>,
    %c0_i32_8 = arith.constant 0 : i32
    %9 = arith.cmpi eq, %arg1, %c0_i32_8 : i32
    %10 = arith.extui %9 : i1 to i32
    %c0_i32_9 = arith.constant 0 : i32
    %11 = arith.cmpi ne, %10, %c0_i32_9 : i32
    scf.if %11 {
      %c0_10 = arith.constant 0 : index
      %c0_11 = arith.constant 0 : index
      %12 = vector.load %arg6[%c0_10, %c0_11] : memref<64x8xf32, #tpu.memory_space<vmem>>, vector<64x8xf32>
      %13 = arith.truncf %12 : vector<64x8xf32> to vector<64x8xbf16>
      %c0_12 = arith.constant 0 : index
      %c0_13 = arith.constant 0 : index
      %14 = vector.load %arg4[%c0_12, %c0_13] : memref<64x8xbf16, #tpu.memory_space<vmem>>, vector<64x8xbf16>
      tpu.vector_store %arg4[%c0_12, %c0_13], %13 {strides = array<i32>} : memref<64x8xbf16, #tpu.memory_space<vmem>>, vector<64x8xbf16>,
      %cst_14 = arith.constant dense<0.000000e+00> : vector<8xf32>
      %15 = vector.multi_reduction <add>, %12, %cst_14 [0] : vector<64x8xf32> to vector<8xf32>
      %16 = vector.shape_cast %15 : vector<8xf32> to vector<1x8xf32>
      %c0_15 = arith.constant 0 : index
      %c0_16 = arith.constant 0 : index
      %c0_17 = arith.constant 0 : index
      %17 = vector.load %arg5[%c0_15, %c0_16, %c0_17] : memref<1x2x8xf32, #tpu.memory_space<vmem>>, vector<1x1x8xf32>
      %18 = vector.shape_cast %17 : vector<1x1x8xf32> to vector<1x8xf32>
      %19 = vector.shape_cast %16 : vector<1x8xf32> to vector<1x1x8xf32>
      tpu.vector_store %arg5[%c0_15, %c0_16, %c0_17], %19 {strides = array<i32>} : memref<1x2x8xf32, #tpu.memory_space<vmem>>, vector<1x1x8xf32>,
      %20 = arith.mulf %12, %12 : vector<64x8xf32>
      %cst_18 = arith.constant dense<0.000000e+00> : vector<8xf32>
      %21 = vector.multi_reduction <add>, %20, %cst_18 [0] : vector<64x8xf32> to vector<8xf32>
      %22 = vector.shape_cast %21 : vector<8xf32> to vector<1x8xf32>
      %c0_19 = arith.constant 0 : index
      %c1 = arith.constant 1 : index
      %c0_20 = arith.constant 0 : index
      %23 = vector.load %arg5[%c0_19, %c1, %c0_20] : memref<1x2x8xf32, #tpu.memory_space<vmem>>, vector<1x1x8xf32>
      %24 = vector.shape_cast %23 : vector<1x1x8xf32> to vector<1x8xf32>
      %25 = vector.shape_cast %22 : vector<1x8xf32> to vector<1x1x8xf32>
      tpu.vector_store %arg5[%c0_19, %c1, %c0_20], %25 {strides = array<i32>} : memref<1x2x8xf32, #tpu.memory_space<vmem>>, vector<1x1x8xf32>,
    } else {
    }
    return
  }
  func.func @transform_0(%arg0: i32, %arg1: i32) -> (i32, i32) {
    %c0_i32 = arith.constant 0 : i32
    return %arg0, %arg1 : i32, i32
  }
  func.func @transform_1(%arg0: i32, %arg1: i32) -> (i32, i32) {
    %c0_i32 = arith.constant 0 : i32
    %c0_i32_0 = arith.constant 0 : i32
    return %arg1, %c0_i32 : i32, i32
  }
  func.func @transform_2(%arg0: i32, %arg1: i32) -> (i32, i32) {
    %c0_i32 = arith.constant 0 : i32
    %c0_i32_0 = arith.constant 0 : i32
    return %arg0, %c0_i32 : i32, i32
  }
  func.func @transform_3(%arg0: i32, %arg1: i32) -> (i32, i32, i32) {
    %c0_i32 = arith.constant 0 : i32
    %c0_i32_0 = arith.constant 0 : i32
    %c0_i32_1 = arith.constant 0 : i32
    return %arg0, %c0_i32, %c0_i32_0 : i32, i32, i32
  }
}

module attributes {stable_mosaic.version = 11 : i64} {
  func.func @_residual_epilogue_kernel(%arg0: i32, %arg1: memref<8x128xbf16, #tpu.memory_space<vmem>>, %arg2: memref<8x128xbf16, #tpu.memory_space<vmem>>, %arg3: memref<1x128xf32, #tpu.memory_space<vmem>>, %arg4: memref<1x128xf32, #tpu.memory_space<vmem>>, %arg5: memref<1x128xf32, #tpu.memory_space<vmem>>, %arg6: memref<1x128xf32, #tpu.memory_space<vmem>>, %arg7: memref<8x128xf32, #tpu.memory_space<vmem>>, %arg8: memref<8x128xf32, #tpu.memory_space<vmem>>) attributes {dimension_semantics = [#tpu.dimension_semantics<parallel>], iteration_bounds = array<i64: 1>, scalar_prefetch = 0 : i64, scratch_operands = 0 : i64, tpu.core_type = #tpu.core_type<tc>, window_params = [{transform_indices = @transform_0, window_bounds = array<i64: 8, 128>}, {transform_indices = @transform_1, window_bounds = array<i64: 8, 128>}, {pipeline_mode = #tpu.pipeline_mode<synchronous>, transform_indices = @transform_2, window_bounds = array<i64: 1, 128>}, {pipeline_mode = #tpu.pipeline_mode<synchronous>, transform_indices = @transform_3, window_bounds = array<i64: 1, 128>}, {pipeline_mode = #tpu.pipeline_mode<synchronous>, transform_indices = @transform_4, window_bounds = array<i64: 1, 128>}, {pipeline_mode = #tpu.pipeline_mode<synchronous>, transform_indices = @transform_5, window_bounds = array<i64: 1, 128>}, {transform_indices = @transform_6, window_bounds = array<i64: 8, 128>}, {transform_indices = @transform_7, window_bounds = array<i64: 8, 128>}]} {
    %c0 = arith.constant 0 : index
    %c0_0 = arith.constant 0 : index
    %0 = vector.load %arg1[%c0, %c0_0] : memref<8x128xbf16, #tpu.memory_space<vmem>>, vector<8x128xbf16>
    %1 = arith.extf %0 : vector<8x128xbf16> to vector<8x128xf32>
    %c0_1 = arith.constant 0 : index
    %c0_2 = arith.constant 0 : index
    %2 = vector.load %arg2[%c0_1, %c0_2] : memref<8x128xbf16, #tpu.memory_space<vmem>>, vector<8x128xbf16>
    %3 = arith.extf %2 : vector<8x128xbf16> to vector<8x128xf32>
    %c0_3 = arith.constant 0 : index
    %c0_4 = arith.constant 0 : index
    %4 = vector.load %arg3[%c0_3, %c0_4] : memref<1x128xf32, #tpu.memory_space<vmem>>, vector<1x128xf32>
    %5 = vector.broadcast %4 : vector<1x128xf32> to vector<8x128xf32>
    %6 = arith.mulf %1, %5 : vector<8x128xf32>
    %c0_5 = arith.constant 0 : index
    %c0_6 = arith.constant 0 : index
    %7 = vector.load %arg4[%c0_5, %c0_6] : memref<1x128xf32, #tpu.memory_space<vmem>>, vector<1x128xf32>
    %8 = vector.broadcast %7 : vector<1x128xf32> to vector<8x128xf32>
    %9 = arith.addf %6, %8 : vector<8x128xf32>
    %c0_7 = arith.constant 0 : index
    %c0_8 = arith.constant 0 : index
    %10 = vector.load %arg5[%c0_7, %c0_8] : memref<1x128xf32, #tpu.memory_space<vmem>>, vector<1x128xf32>
    %11 = vector.broadcast %10 : vector<1x128xf32> to vector<8x128xf32>
    %12 = arith.mulf %3, %11 : vector<8x128xf32>
    %c0_9 = arith.constant 0 : index
    %c0_10 = arith.constant 0 : index
    %13 = vector.load %arg6[%c0_9, %c0_10] : memref<1x128xf32, #tpu.memory_space<vmem>>, vector<1x128xf32>
    %14 = vector.broadcast %13 : vector<1x128xf32> to vector<8x128xf32>
    %15 = arith.addf %12, %14 : vector<8x128xf32>
    %16 = arith.addf %9, %15 : vector<8x128xf32>
    %cst = arith.constant 0.000000e+00 : f32
    %17 = vector.broadcast %cst : f32 to vector<8x128xf32>
    %18 = arith.maximumf %16, %17 : vector<8x128xf32>
    %c0_11 = arith.constant 0 : index
    %c0_12 = arith.constant 0 : index
    %19 = vector.load %arg7[%c0_11, %c0_12] : memref<8x128xf32, #tpu.memory_space<vmem>>, vector<8x128xf32>
    tpu.vector_store %arg7[%c0_11, %c0_12], %18 {strides = array<i32>} : memref<8x128xf32, #tpu.memory_space<vmem>>, vector<8x128xf32>,
    %c0_13 = arith.constant 0 : index
    %c0_14 = arith.constant 0 : index
    %20 = vector.load %arg8[%c0_13, %c0_14] : memref<8x128xf32, #tpu.memory_space<vmem>>, vector<8x128xf32>
    tpu.vector_store %arg8[%c0_13, %c0_14], %16 {strides = array<i32>} : memref<8x128xf32, #tpu.memory_space<vmem>>, vector<8x128xf32>,
    return
  }
  func.func @transform_0(%arg0: i32) -> (i32, i32) {
    %c0_i32 = arith.constant 0 : i32
    %c0_i32_0 = arith.constant 0 : i32
    return %arg0, %c0_i32 : i32, i32
  }
  func.func @transform_1(%arg0: i32) -> (i32, i32) {
    %c0_i32 = arith.constant 0 : i32
    %c0_i32_0 = arith.constant 0 : i32
    return %arg0, %c0_i32 : i32, i32
  }
  func.func @transform_2(%arg0: i32) -> (i32, i32) {
    %c0_i32 = arith.constant 0 : i32
    %c0_i32_0 = arith.constant 0 : i32
    %c0_i32_1 = arith.constant 0 : i32
    return %c0_i32, %c0_i32_0 : i32, i32
  }
  func.func @transform_3(%arg0: i32) -> (i32, i32) {
    %c0_i32 = arith.constant 0 : i32
    %c0_i32_0 = arith.constant 0 : i32
    %c0_i32_1 = arith.constant 0 : i32
    return %c0_i32, %c0_i32_0 : i32, i32
  }
  func.func @transform_4(%arg0: i32) -> (i32, i32) {
    %c0_i32 = arith.constant 0 : i32
    %c0_i32_0 = arith.constant 0 : i32
    %c0_i32_1 = arith.constant 0 : i32
    return %c0_i32, %c0_i32_0 : i32, i32
  }
  func.func @transform_5(%arg0: i32) -> (i32, i32) {
    %c0_i32 = arith.constant 0 : i32
    %c0_i32_0 = arith.constant 0 : i32
    %c0_i32_1 = arith.constant 0 : i32
    return %c0_i32, %c0_i32_0 : i32, i32
  }
  func.func @transform_6(%arg0: i32) -> (i32, i32) {
    %c0_i32 = arith.constant 0 : i32
    %c0_i32_0 = arith.constant 0 : i32
    return %arg0, %c0_i32 : i32, i32
  }
  func.func @transform_7(%arg0: i32) -> (i32, i32) {
    %c0_i32 = arith.constant 0 : i32
    %c0_i32_0 = arith.constant 0 : i32
    return %arg0, %c0_i32 : i32, i32
  }
}

</mosaic_0001>

<bundles_post_ra>
// kernel: tile.55
= control target key start
LH: loop header
LB: loop body
LE: loop exit
PB: predicated region body
PF: predicated region fallthrough
CT: control target
= control target key end

     0   :  { %s28_s0 = inlined_call_operand.vmem [shape: f32[8], index: 0, kind: input, shape index: {}]   ;;  %s29_s1 = inlined_call_operand.vmem [shape: f32[16,8], index: 1, kind: output, shape index: {}]  }
   0x1   :  { %v4_v0 = vld [vmem:[%s28_s0] ss:$0 sm:$0xff] }
   0x2   :  { %5 = vst [vmem:[%s29_s1] sm:$0xff] %v4_v0  ;;  %8 = vst [vmem:[%s29_s1 + $0x8] sm:$0xff] %v4_v0 }

// kernel: tile.59
= control target key start
LH: loop header
LB: loop body
LE: loop exit
PB: predicated region body
PF: predicated region fallthrough
CT: control target
= control target key end

     0   :  { %s131_s10 = smov 120   ;;  %s132_s11 = smov 104   ;;  %vm3_vm0 = vcmask 64512   ;;  %vm9_vm1 = vcmask 1048512   ;;  %vm15_vm2 = vcmask 982912   ;;  %vm21_vm3 = vcmask 917312   ;;  %s207_s0 = inlined_call_operand.vmem [shape: f32[16,8], index: 0, kind: input, shape index: {}]   ;;  %s208_s1 = inlined_call_operand.vmem [shape: f32[1,128], index: 1, kind: output, shape index: {}]  }
   0x1   :  { %v101_v0 = vld [vmem:[%s207_s0 + $0xf] sm:$0x1]   ;;  %v103_v1 = vld [vmem:[%s207_s0 + $0xd] sm:$0x1]   ;;  %v102_v2 = vld [vmem:[%s207_s0 + $0xe] sm:$0x1]  }
   0x2   :  { %7 = vrot.lane.b32.xlu0 %v101_v0, %s131_s10  ;;  %19 = vrot.lane.b32.xlu1 %v103_v1, %s132_s11  ;;  %v104_v3 = vld [vmem:[%s207_s0 + $0xc] sm:$0x1]   ;;  %s133_s16 = smov 112   ;;  %s134_s17 = smov 96   ;;  %v105_v4 = vld [vmem:[%s207_s0 + $0xb] sm:$0x1]  }
   0x3   :  { %v106_v5 = vld [vmem:[%s207_s0 + $0xa] sm:$0x1]   ;;  %v2_v6 = vld [vmem:[%s207_s0] sm:$0x1]   ;;  %s135_s24 = smov 88   ;;  %s136_s25 = smov 80  }
   0x4   :  { %4 = vst.msk [vmem:[#allocation0] sm:$0x1] %vm3_vm0, %v2_v6   ;;  %v107_v7 = vld [vmem:[%s207_s0 + $0x9] sm:$0x1]   ;;  %v108_v8 = vld [vmem:[%s207_s0 + $0x8] sm:$0x1]  }
   0x5   :  { %s137_s30 = smov 72   ;;  %s138_s2 = smov 64   ;;  %v109_v9 = vld [vmem:[%s207_s0 + $0x7] sm:$0x1]   ;;  %v110_v10 = vld [vmem:[%s207_s0 + $0x6] sm:$0x1]  }
   0x6   :  { %13 = vrot.lane.b32.xlu0 %v102_v2, %s133_s16  ;;  %25 = vrot.lane.b32.xlu1 %v104_v3, %s134_s17  ;;  %s139_s7 = smov 56   ;;  %s140_s8 = smov 48   ;;  %v111_v11 = vld [vmem:[%s207_s0 + $0x5] sm:$0x1]   ;;  %v112_v12 = vld [vmem:[%s207_s0 + $0x4] sm:$0x1]  }
   0x7   :  { %s141_s13 = smov 40   ;;  %s142_s14 = smov 32   ;;  %v113_v13 = vld [vmem:[%s207_s0 + $0x3] sm:$0x1]   ;;  %v114_v14 = vld [vmem:[%s207_s0 + $0x2] sm:$0x1]  }
   0x8   :  { %s143_s19 = smov 24   ;;  %s144_s20 = smov 16   ;;  %v115_v15 = vld [vmem:[%s207_s0 + $0x1] sm:$0x1]   ;;  %vm27_vm4 = vcmask 851712   ;;  %vm33_vm5 = vcmask 786112  }
   0x9   :  { %s145_s0 = smov 8   ;;  %vm39_vm6 = vcmask 720512   ;;  %vm45_vm7 = vcmask 654912   ;;  %vm51_vm8 = vcmask 589312   ;;  %vm57_vm9 = vcmask 523712  }
   0xa   :  { %31 = vrot.lane.b32.xlu0 %v105_v4, %s135_s24  ;;  %37 = vrot.lane.b32.xlu1 %v106_v5, %s136_s25  ;;  %vm63_vm10 = vcmask 458112   ;;  %vm69_vm11 = vcmask 392512   ;;  %vm75_vm12 = vcmask 326912   ;;  %vm81_vm13 = vcmask 261312  }
   0xb   :  { %vm87_vm14 = vcmask 195712   ;;  %vm93_vm15 = vcmask 130112  }
   0xe   :  { %43 = vrot.lane.b32.xlu0 %v107_v7, %s137_s30  ;;  %49 = vrot.lane.b32.xlu1 %v108_v8, %s138_s2 }
  0x12   :  { %55 = vrot.lane.b32.xlu0 %v109_v9, %s139_s7  ;;  %61 = vrot.lane.b32.xlu1 %v110_v10, %s140_s8 }
  0x16   :  { %67 = vrot.lane.b32.xlu0 %v111_v11, %s141_s13  ;;  %73 = vrot.lane.b32.xlu1 %v112_v12, %s142_s14 }
  0x1a   :  { %79 = vrot.lane.b32.xlu0 %v113_v13, %s143_s19  ;;  %85 = vrot.lane.b32.xlu1 %v114_v14, %s144_s20 }
  0x1e   :  { %91 = vrot.lane.b32.xlu0 %v115_v15, %s145_s0 }
  0x74   :  { %v8_v16 = vpop.permute.xlu0 %7   ;;  %v20_v17 = vpop.permute.xlu1 %19  }
  0x75   :  { %10 = vst.msk [vmem:[#allocation0] sm:$0x1] %vm9_vm1, %v8_v16  }
  0x78   :  { %v14_v18 = vpop.permute.xlu0 %13   ;;  %v26_v19 = vpop.permute.xlu1 %25  }
  0x79   :  { %16 = vst.msk [vmem:[#allocation0] sm:$0x1] %vm15_vm2, %v14_v18  }
  0x7a   :  { %22 = vst.msk [vmem:[#allocation0] sm:$0x1] %vm21_vm3, %v20_v17  }
  0x7b   :  { %28 = vst.msk [vmem:[#allocation0] sm:$0x1] %vm27_vm4, %v26_v19  }
  0x7c   :  { %v32_v20 = vpop.permute.xlu0 %31   ;;  %v38_v21 = vpop.permute.xlu1 %37  }
  0x7d   :  { %34 = vst.msk [vmem:[#allocation0] sm:$0x1] %vm33_vm5, %v32_v20  }
  0x7e   :  { %40 = vst.msk [vmem:[#allocation0] sm:$0x1] %vm39_vm6, %v38_v21  }
  0x80   :  { %v44_v22 = vpop.permute.xlu0 %43   ;;  %v50_v23 = vpop.permute.xlu1 %49  }
  0x81   :  { %46 = vst.msk [vmem:[#allocation0] sm:$0x1] %vm45_vm7, %v44_v22  }
  0x82   :  { %52 = vst.msk [vmem:[#allocation0] sm:$0x1] %vm51_vm8, %v50_v23  }
  0x84   :  { %v56_v24 = vpop.permute.xlu0 %55   ;;  %v62_v25 = vpop.permute.xlu1 %61  }
  0x85   :  { %58 = vst.msk [vmem:[#allocation0] sm:$0x1] %vm57_vm9, %v56_v24  }
  0x86   :  { %64 = vst.msk [vmem:[#allocation0] sm:$0x1] %vm63_vm10, %v62_v25  }
  0x88   :  { %v68_v26 = vpop.permute.xlu0 %67   ;;  %v74_v27 = vpop.permute.xlu1 %73  }
  0x89   :  { %70 = vst.msk [vmem:[#allocation0] sm:$0x1] %vm69_vm11, %v68_v26  }
  0x8a   :  { %76 = vst.msk [vmem:[#allocation0] sm:$0x1] %vm75_vm12, %v74_v27  }
  0x8c   :  { %v80_v28 = vpop.permute.xlu0 %79   ;;  %v86_v29 = vpop.permute.xlu1 %85  }
  0x8d   :  { %82 = vst.msk [vmem:[#allocation0] sm:$0x1] %vm81_vm13, %v80_v28  }
  0x8e   :  { %88 = vst.msk [vmem:[#allocation0] sm:$0x1] %vm87_vm14, %v86_v29  }
  0x90   :  { %v92_v30 = vpop.permute.xlu0 %91  }
  0x91   :  { %94 = vst.msk [vmem:[#allocation0] sm:$0x1] %vm93_vm15, %v92_v30  }
  0x98   :  { %v98_v31 = vld [vmem:[#allocation0] sm:$0x1] }
  0x99   :  { %100 = vst [vmem:[%s208_s1] sm:$0x1] %v98_v31 }

// kernel: a_call__.5
= control target key start
LH: loop header
LB: loop body
LE: loop exit
PB: predicated region body
PF: predicated region fallthrough
CT: control target
= control target key end

     0   :  { %s73_s0 = inlined_call_operand.vmem [shape: bf16[8,128], index: 0, kind: input, shape index: {}]   ;;  %s74_s1 = inlined_call_operand.vmem [shape: f32[1,128], index: 1, kind: input, shape index: {}]   ;;  %s75_s2 = inlined_call_operand.vmem [shape: f32[1,128], index: 2, kind: input, shape index: {}]   ;;  %s76_s3 = inlined_call_operand.vmem [shape: bf16[8,128], index: 3, kind: output, shape index: {}]  }
   0x1   :  { %v14_v0 = vld [vmem:[%s73_s0] sm:$0xf] }
   0x2   :  { %v39_v1 = vld [vmem:[%s74_s1] ss:$0 sm:$0xff]  ;;  %v15_v2 = vunpack.c.l.bf16 %v14_v0 }
   0x3   :  { %v40_v3 = vld [vmem:[%s75_s2] ss:$0 sm:$0xff] }
   0x4   :  { %v23_v4 = vmul.f32 %v39_v1, %v15_v2 }
   0x6   :  { %v31_v5 = vadd.f32 %v40_v3, %v23_v4 }
   0x8   :  { %v32_v6 = vmax.f32 %v31_v5, 0.0 }
   0xa   :  { %v33_v7 = vpack.c.bf16 %v32_v6, %v32_v6 }
   0xc   :  { %34 = vst [vmem:[%s76_s3] sm:$0xf] %v33_v7 }

// kernel: a_call__.4
= control target key start
LH: loop header
LB: loop body
LE: loop exit
PB: predicated region body
PF: predicated region fallthrough
CT: control target
= control target key end

     0   :  { %s1261_s24 = smov 0   ;;  %s1263_s25 = smov 0   ;;  %s1434_s0 = inlined_call_operand.vmem [shape: bf16[128,36], index: 0, kind: input, shape index: {}]   ;;  %s1435_s1 = inlined_call_operand.vmem [shape: bf16[36,8], index: 1, kind: input, shape index: {}]   ;;  %s1436_s2 = inlined_call_operand.vmem [shape: bf16[128,4], index: 2, kind: input, shape index: {}]   ;;  %s1437_s3 = inlined_call_operand.vmem [shape: bf16[4,8], index: 3, kind: input, shape index: {}]   ;;  %s1438_s4 = inlined_call_operand.vmem [shape: bf16[128,8], index: 4, kind: output, shape index: {0}]   ;;  %s1439_s5 = inlined_call_operand.vmem [shape: f32[2,2,8], index: 5, kind: output, shape index: {1}]   ;;  %s1440_s6 = inlined_call_operand.vmem [shape: bf16[128,8], index: 6, kind: output, shape index: {2}]   ;;  %s1441_s7 = inlined_call_operand.vmem [shape: f32[2,2,8], index: 7, kind: output, shape index: {3}]  }
   0x1   :  { %s1265_s26 = smov 0  }
   0x2 LB: > { %s30_s27 = sadd.s32 1, %s1214_s25  ;;  %p1058_p0 = scmp.ge.s32.totalorder %s1218_s26, 1  ;;  %s1218_s26 = sphi %s1265_s26, %s18_s26   ;;  %s1214_s25 = sphi %s1263_s25, %s1443_s25   ;;  %s1210_s24 = sphi %s1261_s24, %s1442_s24  }
   0x3   : > { %p32_p1 = scmp.ge.s32.totalorder %s30_s27, 2  ;;  %p284_p2 = scmp.lt.s32.totalorder %s1218_s26, 3 }
   0x5   : > { %s1445_s27 = smov (%p32_p1, %s30_s27), 0  ;;  %p285_p3 = pnand %p1058_p0, %p284_p2 }
   0x6   : > { %v1185_v0 = vld [vmem:[%s1435_s1] sm:$0xff] (!%p285_p3)   ;;  %vm439_vm0 = vcmask (!%p285_p3), 1041408   ;;  %v1186_v1 = vld [vmem:[%s1435_s1 + $0x8] sm:$0xff] (!%p285_p3)   ;;  %s1059_s9 = sshll.u32 (!%p285_p3), %s1210_s24, 3  ;;  %vm426_vm1 = vcmask (!%p285_p3), 31744   ;;  %vm658_vm2 = vcmask (!%p285_p3), 293888  }
   0x7   : > { %288 = sbr.rel (%p285_p3) target bundleno = 278 (0x116), region = 36  ;;  %1144 = vmatprep.subr.bf16.mxu1 (!%p285_p3), %v1185_v0  ;;  %v405_v2 = vld [vmem:[%s1437_s3] sm:$0x3] (!%p285_p3)  ;;  %p343_p4 = scmp.lt.s32.totalorder (!%p285_p3), %s1059_s9, 15  ;;  %vm388_vm3 = vcmask (!%p285_p3), 64512   ;;  %v1220_v14 = vmov (!%p285_p3), 0.0  }
   0x8   : > { %1145 = vmatpush3.bf16.msra.mxu1 (!%p285_p3), %v1185_v0  ;;  %1158 = vmatprep.subr.msk.bf16.mxu0 (!%p285_p3), %vm439_vm0, %v405_v2  ;;  %v441_v3 = vsel (!%p285_p3), %vm439_vm0, %v405_v2, 0  ;;  %v1188_v4 = vld [vmem:[%s1435_s1 + $0x10] ss:$0 sps:$4 sm:$0x33] (!%p285_p3)   ;;  %391 = vst.msk [vmem:[#allocation2 + $0x10] sm:$0xff] (!%p285_p3), %vm388_vm3, %v1220_v14  ;;  %389 = vst.msk [vmem:[#allocation2] sm:$0xff] (!%p285_p3), %vm388_vm3, %v1220_v14 }
   0x9   : > { %1146 = vmatprep.subr.bf16.mxu1 (!%p285_p3), %v1186_v1  ;;  %1135 = vmatpush3.bf16.msra.mxu0 (!%p285_p3), %v441_v3  ;;  %v673_v6 = vsel (!%p285_p3), %vm439_vm0, %v1188_v4, 0  ;;  %390 = vst.msk [vmem:[#allocation2 + $0x8] sm:$0xff] (!%p285_p3), %vm388_vm3, %v1220_v14  ;;  %392 = vst.msk [vmem:[#allocation2 + $0x18] sm:$0xff] (!%p285_p3), %vm388_vm3, %v1220_v14  ;;  %vm540_vm4 = vcmask (!%p285_p3), 60416   ;;  %p369_p5 = scmp.lt.s32.totalorder (!%p285_p3), %s1210_s24, 1  ;;  %vm570_vm5 = vcmask (!%p285_p3), 57344  }
   0xa   : > { %393 = vst.msk [vmem:[#allocation2 + $0x20] sm:$0xff] (!%p285_p3), %vm388_vm3, %v1220_v14  ;;  %394 = vst.msk [vmem:[#allocation2 + $0x28] sm:$0xff] (!%p285_p3), %vm388_vm3, %v1220_v14 }
   0xb   : > { %395 = vst.msk [vmem:[#allocation2 + $0x30] sm:$0xff] (!%p285_p3), %vm388_vm3, %v1220_v14  ;;  %396 = vst.msk [vmem:[#allocation2 + $0x38] sm:$0xff] (!%p285_p3), %vm388_vm3, %v1220_v14 }
   0xc   : > { %1147 = vmatpush3.bf16.msra.mxu1 (!%p285_p3), %v1186_v1 }
   0xd   : > { %1159 = vmatprep.subr.msk.bf16.mxu1 (!%p285_p3), %vm439_vm0, %v1188_v4 }
   0xe   : > { %s1447_s9 = smov (!%p343_p4, %s1059_s9), 15  ;;  %s1449_s24 = smov (!%p369_p5, %s1210_s24), 1 }
   0xf   : > { %s1296_s14 = sshll.u32 %s1447_s9, 2  ;;  %v604_v23 = vld [vmem:[#allocation2 + $0x10] sm:$0xff]  ;;  %v602_v24 = vld [vmem:[#allocation2] sm:$0xff]  ;;  %s1065_s8 = sshll.u32 %s1449_s24, 1 }
  0x10   : > { %s361_s17 = scalar_lea.vmem %s1436_s2, %s1296_s14  ;;  %s349_s20 = scalar_lea.vmem %s1434_s0, %s1296_s14  ;;  %1149 = vmatpush3.bf16.msra.mxu1 %v673_v6  ;;  %v605_v30 = vld [vmem:[#allocation2 + $0x18] sm:$0xff]  ;;  %v603_v36 = vld [vmem:[#allocation2 + $0x8] sm:$0xff] }
  0x11   : > { %v1187_v5 = vld [vmem:[%s361_s17] sm:$0xff]   ;;  %v1189_v7 = vld [vmem:[%s361_s17 + $0x8] sm:$0xff]   ;;  %v1192_v10 = vld [vmem:[%s361_s17 + $0x10] sm:$0xff]   ;;  %s1324_s23 = scalar_lea.vmem %s1440_s6, %s1296_s14  ;;  %s1359_s30 = scalar_lea.vmem %s1438_s4, %s1296_s14 }
  0x12   : > { %1136 = vmatprep.mubr.msk.bf16.mxu0 %vm426_vm1, %v1187_v5  ;;  %v1190_v8 = vld [vmem:[%s349_s20] sm:$0xff]   ;;  %v1191_v9 = vld [vmem:[%s349_s20 + $0x8] sm:$0xff]   ;;  %v1194_v11 = vld [vmem:[%s349_s20 + $0x10] sm:$0xff]   ;;  %s382_s11 = scalar_lea.vmem %s1441_s7, %s1065_s8  ;;  %s372_s14 = scalar_lea.vmem %s1439_s5, %s1065_s8 }
  0x13   : > { %1137 = vmatmul.mubr.msk.bf16.vlgmr.msra.gmra.mrb[0].mxu0 %vm426_vm1, %v1189_v7  ;;  %1150 = vmatprep.mubr.msk.bf16.mxu1 %vm658_vm2, %v1190_v8  ;;  %v1193_v12 = vld [vmem:[%s361_s17 + $0x18] sm:$0xff]   ;;  %v608_v59 = vld [vmem:[#allocation2 + $0x30] sm:$0xff]  ;;  %v606_v1 = vld [vmem:[#allocation2 + $0x20] sm:$0xff] }
  0x14   : > { %1151 = vmatmul.mubr.msk.bf16.vlgmr.msra.gmra.mrb[0].mxu1 %vm658_vm2, %v1191_v9  ;;  %1140 = vmatprep.mubr.msk.bf16.mxu0 %vm426_vm1, %v1192_v10  ;;  %v1195_v13 = vld [vmem:[%s349_s20 + $0x18] sm:$0xff]  }
  0x15   : > { %1154 = vmatprep.mubr.msk.bf16.mxu1 %vm658_vm2, %v1194_v11  ;;  %v609_v2 = vld [vmem:[#allocation2 + $0x38] sm:$0xff] }
  0x1b   : > { %1141 = vmatmul.mubr.msk.bf16.gmra.mrb[4].mxu0 %vm426_vm1, %v1193_v12 }
  0x1c   : > { %1155 = vmatmul.mubr.msk.bf16.gmra.mrb[4].mxu1 %vm658_vm2, %v1195_v13 }
  0xe6   : > { %v1138_v15 = vpop.f32.mrb[0].mxu0 }
  0xe7   : > { %v1108_v16 = vpack.c.bf16 %v1138_v15, %v1138_v15  ;;  %v477_v17 = vpop.f32.mrb[1].mxu0  ;;  %v574_v18 = vmul.f32 %v1138_v15, %v1138_v15  ;;  %v552_v25 = vsel %vm388_vm3, %v1138_v15, 0.0  ;;  %v1152_v29 = vpop.f32.mrb[0].mxu1 }
  0xe8   : > { %v1106_v19 = vpack.c.bf16 %v477_v17, %v477_v17  ;;  %v549_v20 = vsel %vm388_vm3, %v477_v17, 0.0  ;;  %v572_v21 = vmul.f32 %v477_v17, %v477_v17  ;;  %v1139_v22 = vpop.f32.mrb[2].mxu0  ;;  %v709_v35 = vpop.f32.mrb[1].mxu1  ;;  %v742_v38 = vadd.f32 %v1152_v29, %v604_v23 }
  0xe9   : > { %543 = vst.msk [vmem:[%s1324_s23 + $0x8] sm:$0xf] %vm540_vm4, %v1108_v16  ;;  %v1109_v26 = vpack.c.bf16 %v1139_v22, %v1139_v22  ;;  %v575_v27 = vmul.f32 %v1139_v22, %v1139_v22  ;;  %v480_v28 = vpop.f32.mrb[3].mxu0  ;;  %v740_v39 = vadd.f32 %v709_v35, %v602_v24  ;;  %v1153_v40 = vpop.f32.mrb[2].mxu1  ;;  %v583_v41 = vsel %vm388_vm3, %v574_v18, 0.0 }
  0xea   : > { %541 = vst.msk [vmem:[%s1324_s23] sm:$0xf] %vm540_vm4, %v1106_v19  ;;  %v580_v31 = vsel %vm388_vm3, %v572_v21, 0.0  ;;  %v1107_v32 = vpack.c.bf16 %v480_v28, %v480_v28  ;;  %v550_v33 = vsel %vm388_vm3, %v480_v28, 0.0  ;;  %v573_v34 = vmul.f32 %v480_v28, %v480_v28  ;;  %v712_v44 = vpop.f32.mrb[3].mxu1  ;;  %v607_v28 = vld [vmem:[#allocation2 + $0x28] sm:$0xff] }
  0xeb   : > { %544 = vst.msk [vmem:[%s1324_s23 + $0xc] sm:$0xf] %vm540_vm4, %v1109_v26  ;;  %v551_v37 = vadd.f32 %v550_v33, %v549_v20  ;;  %v743_v43 = vadd.f32 %v1153_v40, %v605_v30  ;;  %v554_v45 = vsel %vm388_vm3, %v1139_v22, 0.0  ;;  %v741_v48 = vadd.f32 %v712_v44, %v603_v36 }
  0xec   : > { %542 = vst.msk [vmem:[%s1324_s23 + $0x4] sm:$0xf] %vm540_vm4, %v1107_v32  ;;  %v581_v42 = vsel %vm388_vm3, %v573_v34, 0.0  ;;  %v585_v49 = vsel %vm388_vm3, %v575_v27, 0.0 }
  0xed   : > { %v553_v46 = vadd.f32 %v552_v25, %v551_v37  ;;  %v582_v47 = vadd.f32 %v581_v42, %v580_v31  ;;  %751 = vst.msk [vmem:[#allocation2 + $0x10] sm:$0xff] %vm388_vm3, %v742_v38  ;;  %749 = vst.msk [vmem:[#allocation2] sm:$0xff] %vm388_vm3, %v740_v39 }
  0xee   : > { %752 = vst.msk [vmem:[#allocation2 + $0x18] sm:$0xff] %vm388_vm3, %v743_v43  ;;  %v1142_v50 = vpop.f32.mrb[4].mxu0  ;;  %750 = vst.msk [vmem:[#allocation2 + $0x8] sm:$0xff] %vm388_vm3, %v741_v48 }
  0xef   : > { %v584_v51 = vadd.f32 %v583_v41, %v582_v47  ;;  %v1112_v52 = vpack.c.bf16 %v1142_v50, %v1142_v50  ;;  %v493_v53 = vpop.f32.mrb[5].mxu0  ;;  %v555_v55 = vadd.f32 %v554_v45, %v553_v46  ;;  %v578_v60 = vmul.f32 %v1142_v50, %v1142_v50  ;;  %v1156_v0 = vpop.f32.mrb[4].mxu1 }
  0xf0   : > { %v1110_v54 = vpack.c.bf16 %v493_v53, %v493_v53  ;;  %v556_v56 = vsel %vm388_vm3, %v493_v53, 0.0  ;;  %v576_v57 = vmul.f32 %v493_v53, %v493_v53  ;;  %v1143_v58 = vpop.f32.mrb[6].mxu0  ;;  %v725_v6 = vpop.f32.mrb[5].mxu1  ;;  %v746_v9 = vadd.f32 %v1156_v0, %v608_v59 }
  0xf1   : > { %547 = vst.msk [vmem:[%s1324_s23 + $0x18] sm:$0xf] %vm540_vm4, %v1112_v52  ;;  %v586_v61 = vadd.f32 %v585_v49, %v584_v51  ;;  %v1113_v62 = vpack.c.bf16 %v1143_v58, %v1143_v58  ;;  %v496_v63 = vpop.f32.mrb[7].mxu0  ;;  %v557_v3 = vadd.f32 %v556_v56, %v555_v55  ;;  %v1157_v10 = vpop.f32.mrb[6].mxu1  ;;  %v560_v13 = vsel %vm388_vm3, %v1142_v50, 0.0 }
  0xf2   : > { %545 = vst.msk [vmem:[%s1324_s23 + $0x10] sm:$0xf] %vm540_vm4, %v1110_v54  ;;  %v587_v4 = vsel %vm388_vm3, %v576_v57, 0.0  ;;  %v1111_v5 = vpack.c.bf16 %v496_v63, %v496_v63  ;;  %v558_v8 = vsel %vm388_vm3, %v496_v63, 0.0  ;;  %v744_v15 = vadd.f32 %v725_v6, %v606_v1  ;;  %v728_v17 = vpop.f32.mrb[7].mxu1 }
  0xf3   : > { %v588_v7 = vadd.f32 %v587_v4, %v586_v61  ;;  %548 = vst.msk [vmem:[%s1324_s23 + $0x1c] sm:$0xf] %vm540_vm4, %v1113_v62  ;;  %v559_v14 = vadd.f32 %v558_v8, %v557_v3  ;;  %v747_v16 = vadd.f32 %v1157_v10, %v609_v2  ;;  %v591_v21 = vsel %vm388_vm3, %v578_v60, 0.0 }
  0xf4   : > { %v762_v11 = vld [vmem:[#allocation2 + $0x10] sm:$0xff]  ;;  %v760_v12 = vld [vmem:[#allocation2] sm:$0xff]  ;;  %546 = vst.msk [vmem:[%s1324_s23 + $0x14] sm:$0xf] %vm540_vm4, %v1111_v5  ;;  %v577_v22 = vmul.f32 %v496_v63, %v496_v63  ;;  %v562_v26 = vsel %vm388_vm3, %v1143_v58, 0.0  ;;  %v579_v27 = vmul.f32 %v1143_v58, %v1143_v58  ;;  %v745_v40 = vadd.f32 %v728_v17, %v607_v28 }
  0xf5   : > { %v1116_v18 = vpack.c.bf16 %v762_v11, %v762_v11  ;;  %v1114_v19 = vpack.c.bf16 %v760_v12, %v760_v12  ;;  %v763_v20 = vld [vmem:[#allocation2 + $0x18] sm:$0xff]  ;;  %755 = vst.msk [vmem:[#allocation2 + $0x30] sm:$0xff] %vm388_vm3, %v746_v9  ;;  %v832_v23 = vmul.f32 %v760_v12, %v760_v12  ;;  %v761_v25 = vld [vmem:[#allocation2 + $0x8] sm:$0xff]  ;;  %753 = vst.msk [vmem:[#allocation2 + $0x20] sm:$0xff] %vm388_vm3, %v744_v15  ;;  %v812_v29 = vsel %vm388_vm3, %v762_v11, 0.0 }
  0xf6   : > { %v1117_v24 = vpack.c.bf16 %v763_v20, %v763_v20  ;;  %756 = vst.msk [vmem:[#allocation2 + $0x38] sm:$0xff] %vm388_vm3, %v747_v16  ;;  %v809_v30 = vsel %vm388_vm3, %v760_v12, 0.0  ;;  %v1115_v31 = vpack.c.bf16 %v761_v25, %v761_v25  ;;  %v810_v32 = vsel %vm388_vm3, %v761_v25, 0.0  ;;  %754 = vst.msk [vmem:[#allocation2 + $0x28] sm:$0xff] %vm388_vm3, %v745_v40 }
  0xf7   : > { %803 = vst.msk [vmem:[%s1359_s30 + $0x8] sm:$0xf] %vm540_vm4, %v1116_v18  ;;  %801 = vst.msk [vmem:[%s1359_s30] sm:$0xf] %vm540_vm4, %v1114_v19  ;;  %v834_v33 = vmul.f32 %v762_v11, %v762_v11  ;;  %v811_v34 = vadd.f32 %v810_v32, %v809_v30  ;;  %v833_v35 = vmul.f32 %v761_v25, %v761_v25  ;;  %v840_v37 = vsel %vm388_vm3, %v832_v23, 0.0 }
  0xf8   : > { %804 = vst.msk [vmem:[%s1359_s30 + $0xc] sm:$0xf] %vm540_vm4, %v1117_v24  ;;  %v561_v36 = vadd.f32 %v560_v13, %v559_v14  ;;  %v835_v38 = vmul.f32 %v763_v20, %v763_v20  ;;  %802 = vst.msk [vmem:[%s1359_s30 + $0x4] sm:$0xf] %vm540_vm4, %v1115_v31  ;;  %v589_v39 = vsel %vm388_vm3, %v577_v22, 0.0  ;;  %v814_v45 = vsel %vm388_vm3, %v763_v20, 0.0 }
  0xf9   : > { %v813_v41 = vadd.f32 %v812_v29, %v811_v34  ;;  %v841_v42 = vsel %vm388_vm3, %v833_v35, 0.0  ;;  %v590_v44 = vadd.f32 %v589_v39, %v588_v7  ;;  %v593_v47 = vsel %vm388_vm3, %v579_v27, 0.0 }
  0xfa   : > { %v563_v43 = vadd.f32 %v562_v26, %v561_v36  ;;  %v842_v46 = vadd.f32 %v841_v42, %v840_v37  ;;  %v843_v48 = vsel %vm388_vm3, %v834_v33, 0.0  ;;  %v845_v53 = vsel %vm388_vm3, %v835_v38, 0.0 }
  0xfb   : > { %v592_v50 = vadd.f32 %v591_v21, %v590_v44  ;;  %v815_v52 = vadd.f32 %v814_v45, %v813_v41 }
  0xfc   : > { %v564_v49 = vrot.slane %v563_v43, 4  ;;  %v766_v51 = vld [vmem:[#allocation2 + $0x30] sm:$0xff]  ;;  %v844_v54 = vadd.f32 %v843_v48, %v842_v46  ;;  %v764_v56 = vld [vmem:[#allocation2 + $0x20] sm:$0xff] }
  0xfd   : > { %v1120_v55 = vpack.c.bf16 %v766_v51, %v766_v51  ;;  %v767_v57 = vld [vmem:[#allocation2 + $0x38] sm:$0xff]  ;;  %v594_v59 = vadd.f32 %v593_v47, %v592_v50  ;;  %v1118_v60 = vpack.c.bf16 %v764_v56, %v764_v56  ;;  %v816_v61 = vsel %vm388_vm3, %v764_v56, 0.0  ;;  %v765_v8 = vld [vmem:[#allocation2 + $0x28] sm:$0xff] }
  0xfe   : > { %v565_v58 = vadd.f32 %v564_v49, %v563_v43  ;;  %v836_v62 = vmul.f32 %v764_v56, %v764_v56  ;;  %v846_v63 = vadd.f32 %v845_v53, %v844_v54  ;;  %v817_v2 = vadd.f32 %v816_v61, %v815_v52 }
  0xff   : > { %807 = vst.msk [vmem:[%s1359_s30 + $0x18] sm:$0xf] %vm540_vm4, %v1120_v55  ;;  %v595_v1 = vrot.slane %v594_v59, 4  ;;  %805 = vst.msk [vmem:[%s1359_s30 + $0x10] sm:$0xf] %vm540_vm4, %v1118_v60  ;;  %v1121_v3 = vpack.c.bf16 %v767_v57, %v767_v57  ;;  %v838_v9 = vmul.f32 %v766_v51, %v766_v51  ;;  %v1119_v10 = vpack.c.bf16 %v765_v8, %v765_v8 }
 0x100   : > { %v566_v0 = vrot.slane %v565_v58, 2  ;;  %v847_v4 = vsel %vm388_vm3, %v836_v62, 0.0  ;;  %v818_v11 = vsel %vm388_vm3, %v765_v8, 0.0  ;;  %v837_v12 = vmul.f32 %v765_v8, %v765_v8 }
 0x101   : > { %v596_v6 = vadd.f32 %v595_v1, %v594_v59  ;;  %v848_v7 = vadd.f32 %v847_v4, %v846_v63  ;;  %808 = vst.msk [vmem:[%s1359_s30 + $0x1c] sm:$0xf] %vm540_vm4, %v1121_v3  ;;  %v819_v15 = vadd.f32 %v818_v11, %v817_v2  ;;  %v820_v16 = vsel %vm388_vm3, %v766_v51, 0.0  ;;  %806 = vst.msk [vmem:[%s1359_s30 + $0x14] sm:$0xf] %vm540_vm4, %v1119_v10 }
 0x102   : > { %v567_v5 = vadd.f32 %v566_v0, %v565_v58  ;;  %v839_v17 = vmul.f32 %v767_v57, %v767_v57  ;;  %v849_v18 = vsel %vm388_vm3, %v837_v12, 0.0  ;;  %v851_v23 = vsel %vm388_vm3, %v838_v9, 0.0 }
 0x103   : > { %v597_v14 = vrot.slane %v596_v6, 2  ;;  %v821_v21 = vadd.f32 %v820_v16, %v819_v15  ;;  %v850_v22 = vadd.f32 %v849_v18, %v848_v7  ;;  %v822_v24 = vsel %vm388_vm3, %v767_v57, 0.0 }
 0x104   : > { %v568_v13 = vrot.slane %v567_v5, 1  ;;  %v853_v28 = vsel %vm388_vm3, %v839_v17, 0.0 }
 0x105   : > { %v598_v20 = vadd.f32 %v597_v14, %v596_v6  ;;  %v823_v26 = vadd.f32 %v822_v24, %v821_v21  ;;  %v852_v27 = vadd.f32 %v851_v23, %v850_v22 }
 0x106   : > { %v569_v19 = vadd.f32 %v568_v13, %v567_v5 }
 0x107   : > { %v599_v25 = vrot.slane %v598_v20, 1  ;;  %v824_v30 = vrot.slane %v823_v26, 4  ;;  %v854_v31 = vadd.f32 %v853_v28, %v852_v27 }
 0x108   : > { %571 = vst.msk [vmem:[%s382_s11] sm:$0x1] %vm570_vm5, %v569_v19 }
 0x109   : > { %v600_v29 = vadd.f32 %v599_v25, %v598_v20  ;;  %v825_v32 = vadd.f32 %v824_v30, %v823_v26  ;;  %v855_v33 = vrot.slane %v854_v31, 4 }
 0x10b   : > { %601 = vst.msk [vmem:[%s382_s11 + $0x1] sm:$0x1] %vm570_vm5, %v600_v29  ;;  %v826_v34 = vrot.slane %v825_v32, 2  ;;  %v856_v35 = vadd.f32 %v855_v33, %v854_v31 }
 0x10d   : > { %v827_v36 = vadd.f32 %v826_v34, %v825_v32  ;;  %v857_v37 = vrot.slane %v856_v35, 2 }
 0x10f   : > { %v828_v38 = vrot.slane %v827_v36, 1  ;;  %v858_v39 = vadd.f32 %v857_v37, %v856_v35 }
 0x111   : > { %v829_v40 = vadd.f32 %v828_v38, %v827_v36  ;;  %v859_v41 = vrot.slane %v858_v39, 1 }
 0x113   : > { %831 = vst.msk [vmem:[%s372_s14] sm:$0x1] %vm570_vm5, %v829_v40  ;;  %v860_v42 = vadd.f32 %v859_v41, %v858_v39 }
 0x115   : > { %861 = vst.msk [vmem:[%s372_s14 + $0x1] sm:$0x1] %vm570_vm5, %v860_v42 }
 0x116 PF: > { %s18_s26 = sadd.s32 1, %s1218_s26   ;;  %s1442_s24 = smov %s1214_s25 }
 0x117   : > { %p15_p6 = scmp.ge.s32.totalorder %s18_s26, 4   ;;  %s1443_s25 = smov %s1445_s27 }
 0x119   :  { %17 = sbr.rel (!%p15_p6) target bundleno = 2 (0x2), region = 116 }

// kernel: a_call__.7
= control target key start
LH: loop header
LB: loop body
LE: loop exit
PB: predicated region body
PF: predicated region fallthrough
CT: control target
= control target key end

     0   :  { %s141_s0 = inlined_call_operand.vmem [shape: bf16[8,128], index: 0, kind: input, shape index: {}]   ;;  %s142_s1 = inlined_call_operand.vmem [shape: bf16[8,128], index: 1, kind: input, shape index: {}]   ;;  %s143_s2 = inlined_call_operand.vmem [shape: f32[1,128], index: 2, kind: input, shape index: {}]   ;;  %s144_s3 = inlined_call_operand.vmem [shape: f32[1,128], index: 3, kind: input, shape index: {}]   ;;  %s145_s4 = inlined_call_operand.vmem [shape: f32[1,128], index: 4, kind: input, shape index: {}]   ;;  %s146_s5 = inlined_call_operand.vmem [shape: f32[1,128], index: 5, kind: input, shape index: {}]   ;;  %s147_s7 = inlined_call_operand.vmem [shape: f32[8,128], index: 7, kind: output, shape index: {1}]   ;;  %s148_s6 = inlined_call_operand.vmem [shape: f32[8,128], index: 6, kind: output, shape index: {0}]  }
   0x1   :  { %v25_v0 = vld [vmem:[%s141_s0] sm:$0xf] }
   0x2   :  { %v27_v1 = vld [vmem:[%s142_s1] sm:$0xf]  ;;  %v26_v3 = vunpack.c.l.bf16 %v25_v0 }
   0x3   :  { %v73_v2 = vld [vmem:[%s143_s2] ss:$0 sm:$0xff]  ;;  %v28_v4 = vunpack.c.l.bf16 %v27_v1 }
   0x4   :  { %v75_v5 = vld [vmem:[%s145_s4] ss:$0 sm:$0xff]  ;;  %v36_v8 = vmul.f32 %v73_v2, %v26_v3 }
   0x5   :  { %v74_v6 = vld [vmem:[%s144_s3] ss:$0 sm:$0xff]  ;;  %v52_v9 = vmul.f32 %v75_v5, %v28_v4 }
   0x6   :  { %v76_v7 = vld [vmem:[%s146_s5] ss:$0 sm:$0xff]  ;;  %v44_v10 = vadd.f32 %v74_v6, %v36_v8 }
   0x7   :  { %v60_v11 = vadd.f32 %v76_v7, %v52_v9 }
   0x9   :  { %v61_v12 = vadd.f32 %v60_v11, %v44_v10 }
   0xb   :  { %v62_v13 = vmax.f32 %v61_v12, 0.0  ;;  %64 = vst [vmem:[%s147_s7] sm:$0xff] %v61_v12 }
   0xd   :  { %63 = vst [vmem:[%s148_s6] sm:$0xff] %v62_v13 }

// kernel: a_call__.6
= control target key start
LH: loop header
LB: loop body
LE: loop exit
PB: predicated region body
PF: predicated region fallthrough
CT: control target
= control target key end

     0   :  { %s794_s12 = smov 0   ;;  %s796_s13 = smov 0   ;;  %s911_s0 = inlined_call_operand.vmem [shape: bf16[128,72], index: 0, kind: input, shape index: {}]   ;;  %s912_s1 = inlined_call_operand.vmem [shape: bf16[72,8], index: 1, kind: input, shape index: {}]   ;;  %s913_s2 = inlined_call_operand.vmem [shape: bf16[128,8], index: 2, kind: output, shape index: {0}]   ;;  %s914_s3 = inlined_call_operand.vmem [shape: f32[2,2,8], index: 3, kind: output, shape index: {1}]  }
   0x1   :  { %s798_s14 = smov 0  }
   0x2 LB: > { %s26_s15 = sadd.s32 1, %s767_s13  ;;  %p639_p0 = scmp.ge.s32.totalorder %s771_s14, 1  ;;  %s771_s14 = sphi %s798_s14, %s14_s14   ;;  %s767_s13 = sphi %s796_s13, %s916_s13   ;;  %s763_s12 = sphi %s794_s12, %s915_s12  }
   0x3   : > { %p28_p1 = scmp.ge.s32.totalorder %s26_s15, 2  ;;  %p169_p2 = scmp.lt.s32.totalorder %s771_s14, 3 }
   0x5   : > { %s918_s15 = smov (%p28_p1, %s26_s15), 0  ;;  %p170_p3 = pnand %p639_p0, %p169_p2 }
   0x6   : > { %v740_v0 = vld [vmem:[%s912_s1] sm:$0xff] (!%p170_p3)   ;;  %v741_v1 = vld [vmem:[%s912_s1 + $0x8] sm:$0xff] (!%p170_p3)   ;;  %s640_s20 = sshll.u32 (!%p170_p3), %s763_s12, 3  ;;  %v742_v2 = vld [vmem:[%s912_s1 + $0x10] sm:$0xff] (!%p170_p3)   ;;  %vm235_vm0 = vcmask (!%p170_p3), 64512   ;;  %v773_v3 = vmov (!%p170_p3), 0.0  }
   0x7   : > { %173 = sbr.rel (%p170_p3) target bundleno = 282 (0x11a), region = 28  ;;  %685 = vmatprep.subr.bf16.mxu0 (!%p170_p3), %v740_v0  ;;  %703 = vmatprep.subr.bf16.mxu1 (!%p170_p3), %v740_v0  ;;  %p206_p4 = scmp.lt.s32.totalorder (!%p170_p3), %s640_s20, 15  ;;  %238 = vst.msk [vmem:[#allocation2 + $0x10] sm:$0xff] (!%p170_p3), %vm235_vm0, %v773_v3  ;;  %236 = vst.msk [vmem:[#allocation2] sm:$0xff] (!%p170_p3), %vm235_vm0, %v773_v3  ;;  %v743_v4 = vld [vmem:[%s912_s1 + $0x18] sm:$0xff] (!%p170_p3)   ;;  %vm316_vm1 = vcmask (!%p170_p3), 588800  }
   0x8   : > { %686 = vmatpush3.bf16.msra.mxu0 (!%p170_p3), %v740_v0  ;;  %708 = vmatpush3.bf16.msra.mxu1 (!%p170_p3), %v740_v0  ;;  %237 = vst.msk [vmem:[#allocation2 + $0x8] sm:$0xff] (!%p170_p3), %vm235_vm0, %v773_v3  ;;  %239 = vst.msk [vmem:[#allocation2 + $0x18] sm:$0xff] (!%p170_p3), %vm235_vm0, %v773_v3  ;;  %v744_v7 = vld [vmem:[%s912_s1 + $0x20] ss:$0 sps:$4 sm:$0xff] (!%p170_p3)   ;;  %vm329_vm2 = vcmask (!%p170_p3), 1043456   ;;  %vm458_vm3 = vcmask (!%p170_p3), 60416  }
   0x9   : > { %687 = vmatprep.subr.bf16.mxu0 (!%p170_p3), %v741_v1  ;;  %704 = vmatprep.subr.bf16.mxu1 (!%p170_p3), %v741_v1  ;;  %240 = vst.msk [vmem:[#allocation2 + $0x20] sm:$0xff] (!%p170_p3), %vm235_vm0, %v773_v3  ;;  %241 = vst.msk [vmem:[#allocation2 + $0x28] sm:$0xff] (!%p170_p3), %vm235_vm0, %v773_v3  ;;  %v331_v8 = vsel (!%p170_p3), %vm329_vm2, %v744_v7, 0  ;;  %p226_p5 = scmp.lt.s32.totalorder (!%p170_p3), %s763_s12, 1  ;;  %vm488_vm4 = vcmask (!%p170_p3), 57344  }
   0xa   : > { %242 = vst.msk [vmem:[#allocation2 + $0x30] sm:$0xff] (!%p170_p3), %vm235_vm0, %v773_v3  ;;  %243 = vst.msk [vmem:[#allocation2 + $0x38] sm:$0xff] (!%p170_p3), %vm235_vm0, %v773_v3 }
   0xc   : > { %688 = vmatpush3.bf16.msra.mxu0 (!%p170_p3), %v741_v1  ;;  %709 = vmatpush3.bf16.msra.mxu1 (!%p170_p3), %v741_v1 }
   0xd   : > { %689 = vmatprep.subr.bf16.mxu0 (!%p170_p3), %v742_v2  ;;  %705 = vmatprep.subr.bf16.mxu1 (!%p170_p3), %v742_v2 }
   0xe   : > { %s920_s20 = smov (!%p206_p4, %s640_s20), 15  ;;  %v246_v11 = vld [vmem:[#allocation2 + $0x10] sm:$0xff]  ;;  %v244_v13 = vld [vmem:[#allocation2] sm:$0xff]  ;;  %s922_s12 = smov (!%p226_p5, %s763_s12), 1 }
   0xf   : > { %s641_s23 = sshll.u32 %s920_s20, 2  ;;  %v247_v16 = vld [vmem:[#allocation2 + $0x18] sm:$0xff]  ;;  %v245_v21 = vld [vmem:[#allocation2 + $0x8] sm:$0xff]  ;;  %s644_s7 = sshll.u32 %s922_s12, 1 }
  0x10   : > { %s212_s28 = scalar_lea.vmem %s911_s0, %s641_s23  ;;  %690 = vmatpush3.bf16.msra.mxu0 %v742_v2  ;;  %710 = vmatpush3.bf16.msra.mxu1 %v742_v2  ;;  %v248_v14 = vld [vmem:[#allocation2 + $0x20] sm:$0xff]  ;;  %v249_v24 = vld [vmem:[#allocation2 + $0x28] sm:$0xff]  ;;  %s863_s6 = scalar_lea.vmem %s913_s2, %s641_s23 }
  0x11   : > { %v745_v5 = vld [vmem:[%s212_s28] sm:$0xff]   ;;  %v747_v6 = vld [vmem:[%s212_s28 + $0x10] sm:$0xff]   ;;  %691 = vmatprep.subr.bf16.mxu0 %v743_v4  ;;  %706 = vmatprep.subr.bf16.mxu1 %v743_v4  ;;  %v746_v9 = vld [vmem:[%s212_s28 + $0x8] sm:$0xff]   ;;  %s229_s10 = scalar_lea.vmem %s914_s3, %s644_s7 }
  0x12   : > { %695 = vmatprep.mubr.msk.bf16.mxu0 %vm316_vm1, %v745_v5  ;;  %699 = vmatprep.mubr.msk.bf16.mxu1 %vm316_vm1, %v747_v6  ;;  %v748_v10 = vld [vmem:[%s212_s28 + $0x18] sm:$0xff]   ;;  %v250_v12 = vld [vmem:[#allocation2 + $0x30] sm:$0xff] }
  0x13   : > { %v251_v18 = vld [vmem:[#allocation2 + $0x38] sm:$0xff] }
  0x14   : > { %692 = vmatpush3.bf16.msra.mxu0 %v743_v4  ;;  %711 = vmatpush3.bf16.msra.mxu1 %v743_v4 }
  0x15   : > { %713 = vmatprep.subr.msk.bf16.mxu0 %vm329_vm2, %v744_v7  ;;  %714 = vmatprep.subr.msk.bf16.mxu1 %vm329_vm2, %v744_v7 }
  0x18   : > { %694 = vmatpush3.bf16.msra.mxu0 %v331_v8  ;;  %712 = vmatpush3.bf16.msra.mxu1 %v331_v8 }
  0x1b   : > { %696 = vmatmul.mubr.msk.bf16.vlgmr.msra.gmra.mrb[0].mxu0 %vm316_vm1, %v746_v9  ;;  %700 = vmatmul.mubr.msk.bf16.vlgmr.msra.gmra.mrb[0].mxu1 %vm316_vm1, %v748_v10 }
  0xee   : > { %v697_v15 = vpop.f32.mrb[0].mxu0  ;;  %v701_v17 = vpop.f32.mrb[0].mxu1 }
  0xef   : > { %v400_v19 = vadd.f32 %v697_v15, %v246_v11  ;;  %v367_v20 = vpop.f32.mrb[1].mxu0  ;;  %v404_v22 = vadd.f32 %v701_v17, %v250_v12  ;;  %v383_v23 = vpop.f32.mrb[1].mxu1 }
  0xf0   : > { %v398_v25 = vadd.f32 %v367_v20, %v244_v13  ;;  %v698_v26 = vpop.f32.mrb[2].mxu0  ;;  %v402_v27 = vadd.f32 %v383_v23, %v248_v14  ;;  %v702_v28 = vpop.f32.mrb[2].mxu1 }
  0xf1   : > { %409 = vst.msk [vmem:[#allocation2 + $0x10] sm:$0xff] %vm235_vm0, %v400_v19  ;;  %v401_v29 = vadd.f32 %v698_v26, %v247_v16  ;;  %v370_v30 = vpop.f32.mrb[3].mxu0  ;;  %413 = vst.msk [vmem:[#allocation2 + $0x30] sm:$0xff] %vm235_vm0, %v404_v22  ;;  %v405_v31 = vadd.f32 %v702_v28, %v251_v18  ;;  %v386_v32 = vpop.f32.mrb[3].mxu1 }
  0xf2   : > { %407 = vst.msk [vmem:[#allocation2] sm:$0xff] %vm235_vm0, %v398_v25  ;;  %v399_v33 = vadd.f32 %v370_v30, %v245_v21  ;;  %411 = vst.msk [vmem:[#allocation2 + $0x20] sm:$0xff] %vm235_vm0, %v402_v27  ;;  %v403_v34 = vadd.f32 %v386_v32, %v249_v24 }
  0xf3   : > { %410 = vst.msk [vmem:[#allocation2 + $0x18] sm:$0xff] %vm235_vm0, %v401_v29  ;;  %414 = vst.msk [vmem:[#allocation2 + $0x38] sm:$0xff] %vm235_vm0, %v405_v31 }
  0xf4   : > { %408 = vst.msk [vmem:[#allocation2 + $0x8] sm:$0xff] %vm235_vm0, %v399_v33  ;;  %412 = vst.msk [vmem:[#allocation2 + $0x28] sm:$0xff] %vm235_vm0, %v403_v34 }
  0xf8   : > { %v420_v35 = vld [vmem:[#allocation2 + $0x10] sm:$0xff] }
  0xf9   : > { %v424_v36 = vld [vmem:[#allocation2 + $0x30] sm:$0xff]  ;;  %v670_v37 = vpack.c.bf16 %v420_v35, %v420_v35  ;;  %v418_v38 = vld [vmem:[#allocation2] sm:$0xff]  ;;  %v492_v44 = vmul.f32 %v420_v35, %v420_v35  ;;  %v470_v52 = vsel %vm235_vm0, %v420_v35, 0.0 }
  0xfa   : > { %v674_v39 = vpack.c.bf16 %v424_v36, %v424_v36  ;;  %v668_v40 = vpack.c.bf16 %v418_v38, %v418_v38  ;;  %v490_v41 = vmul.f32 %v418_v38, %v418_v38  ;;  %v421_v42 = vld [vmem:[#allocation2 + $0x18] sm:$0xff]  ;;  %v422_v43 = vld [vmem:[#allocation2 + $0x20] sm:$0xff]  ;;  %v467_v48 = vsel %vm235_vm0, %v418_v38, 0.0 }
  0xfb   : > { %461 = vst.msk [vmem:[%s863_s6 + $0x8] sm:$0xf] %vm458_vm3, %v670_v37  ;;  %v671_v45 = vpack.c.bf16 %v421_v42, %v421_v42  ;;  %v419_v46 = vld [vmem:[#allocation2 + $0x8] sm:$0xff]  ;;  %v425_v47 = vld [vmem:[#allocation2 + $0x38] sm:$0xff]  ;;  %v493_v53 = vmul.f32 %v421_v42, %v421_v42  ;;  %v672_v55 = vpack.c.bf16 %v422_v43, %v422_v43  ;;  %v494_v59 = vmul.f32 %v422_v43, %v422_v43 }
  0xfc   : > { %465 = vst.msk [vmem:[%s863_s6 + $0x18] sm:$0xf] %vm458_vm3, %v674_v39  ;;  %459 = vst.msk [vmem:[%s863_s6] sm:$0xf] %vm458_vm3, %v668_v40  ;;  %v669_v49 = vpack.c.bf16 %v419_v46, %v419_v46  ;;  %v468_v50 = vsel %vm235_vm0, %v419_v46, 0.0  ;;  %v491_v51 = vmul.f32 %v419_v46, %v419_v46  ;;  %v423_v56 = vld [vmem:[#allocation2 + $0x28] sm:$0xff]  ;;  %v675_v60 = vpack.c.bf16 %v425_v47, %v425_v47 }
  0xfd   : > { %462 = vst.msk [vmem:[%s863_s6 + $0xc] sm:$0xf] %vm458_vm3, %v671_v45  ;;  %v469_v54 = vadd.f32 %v468_v50, %v467_v48  ;;  %v498_v57 = vsel %vm235_vm0, %v490_v41, 0.0  ;;  %463 = vst.msk [vmem:[%s863_s6 + $0x10] sm:$0xf] %vm458_vm3, %v672_v55  ;;  %v501_v63 = vsel %vm235_vm0, %v492_v44, 0.0  ;;  %v673_v2 = vpack.c.bf16 %v423_v56, %v423_v56 }
  0xfe   : > { %460 = vst.msk [vmem:[%s863_s6 + $0x4] sm:$0xf] %vm458_vm3, %v669_v49  ;;  %v499_v58 = vsel %vm235_vm0, %v491_v51, 0.0  ;;  %v472_v0 = vsel %vm235_vm0, %v421_v42, 0.0  ;;  %v474_v1 = vsel %vm235_vm0, %v422_v43, 0.0  ;;  %v503_v5 = vsel %vm235_vm0, %v493_v53, 0.0 }
  0xff   : > { %v471_v61 = vadd.f32 %v470_v52, %v469_v54  ;;  %v500_v62 = vadd.f32 %v499_v58, %v498_v57  ;;  %466 = vst.msk [vmem:[%s863_s6 + $0x1c] sm:$0xf] %vm458_vm3, %v675_v60  ;;  %v505_v6 = vsel %vm235_vm0, %v494_v59, 0.0  ;;  %464 = vst.msk [vmem:[%s863_s6 + $0x14] sm:$0xf] %vm458_vm3, %v673_v2  ;;  %v495_v7 = vmul.f32 %v423_v56, %v423_v56 }
 0x100   : > { %v496_v10 = vmul.f32 %v424_v36, %v424_v36  ;;  %v476_v11 = vsel %vm235_vm0, %v423_v56, 0.0  ;;  %v478_v14 = vsel %vm235_vm0, %v424_v36, 0.0  ;;  %v497_v15 = vmul.f32 %v425_v47, %v425_v47 }
 0x101   : > { %v502_v3 = vadd.f32 %v501_v63, %v500_v62  ;;  %v473_v4 = vadd.f32 %v472_v0, %v471_v61  ;;  %v507_v16 = vsel %vm235_vm0, %v495_v7, 0.0  ;;  %v480_v20 = vsel %vm235_vm0, %v425_v47, 0.0 }
 0x102   : > { %v509_v19 = vsel %vm235_vm0, %v496_v10, 0.0  ;;  %v511_v23 = vsel %vm235_vm0, %v497_v15, 0.0 }
 0x103   : > { %v475_v8 = vadd.f32 %v474_v1, %v473_v4  ;;  %v504_v9 = vadd.f32 %v503_v5, %v502_v3 }
 0x105   : > { %v506_v12 = vadd.f32 %v505_v6, %v504_v9  ;;  %v477_v13 = vadd.f32 %v476_v11, %v475_v8 }
 0x107   : > { %v479_v17 = vadd.f32 %v478_v14, %v477_v13  ;;  %v508_v18 = vadd.f32 %v507_v16, %v506_v12 }
 0x109   : > { %v481_v21 = vadd.f32 %v480_v20, %v479_v17  ;;  %v510_v22 = vadd.f32 %v509_v19, %v508_v18 }
 0x10b   : > { %v482_v24 = vrot.slane %v481_v21, 4  ;;  %v512_v25 = vadd.f32 %v511_v23, %v510_v22 }
 0x10d   : > { %v483_v26 = vadd.f32 %v482_v24, %v481_v21  ;;  %v513_v27 = vrot.slane %v512_v25, 4 }
 0x10f   : > { %v484_v28 = vrot.slane %v483_v26, 2  ;;  %v514_v29 = vadd.f32 %v513_v27, %v512_v25 }
 0x111   : > { %v485_v30 = vadd.f32 %v484_v28, %v483_v26  ;;  %v515_v31 = vrot.slane %v514_v29, 2 }
 0x113   : > { %v486_v32 = vrot.slane %v485_v30, 1  ;;  %v516_v33 = vadd.f32 %v515_v31, %v514_v29 }
 0x115   : > { %v487_v34 = vadd.f32 %v486_v32, %v485_v30  ;;  %v517_v35 = vrot.slane %v516_v33, 1 }
 0x117   : > { %489 = vst.msk [vmem:[%s229_s10] sm:$0x1] %vm488_vm4, %v487_v34  ;;  %v518_v36 = vadd.f32 %v517_v35, %v516_v33 }
 0x119   : > { %519 = vst.msk [vmem:[%s229_s10 + $0x1] sm:$0x1] %vm488_vm4, %v518_v36 }
 0x11a PF: > { %s14_s14 = sadd.s32 1, %s771_s14   ;;  %s915_s12 = smov %s767_s13 }
 0x11b   : > { %p11_p6 = scmp.ge.s32.totalorder %s14_s14, 4   ;;  %s916_s13 = smov %s918_s15 }
 0x11d   :  { %13 = sbr.rel (!%p11_p6) target bundleno = 2 (0x2), region = 81 }

</bundles_post_ra>
